<compile_context>
chip_gen: v7x
topology: tpu7x:2x2x1
jax: 0.10.0
libtpu: 0.0.40
codegen_flags: <defaults>
</compile_context>

<pallas_src>
import jax
import jax.numpy as jnp
from jax.experimental import pallas as pl
from jax.experimental.pallas import tpu as pltpu


def _dqn1_kernel(cw_ref, cb_ref,            # SMEM: conv weights (9,), conv bias (1,)
                 taps_ref,                  # VMEM: (9, 2, B*n, n) pre-shifted conv taps
                 m1_ref, p1bd_ref, b1_ref,  # (n, n2) = P1^T W1^T, block-diag P1 (B*n2, B*n), bias (1, n2)
                 m2_ref, p2bd_ref, b2_ref,  # (n2, n4), block-diag P2 (B*n4, B*n2), bias (1, n4)
                 w3t_ref, ssum_ref, b3_ref, # w3 tiled (A, B*n4, n4), block row-sum (B, B*n4), bias (1, A)
                 out_ref):                  # VMEM out: (B, A)
    f32 = jnp.float32
    n_actions = w3t_ref.shape[0]

    # --- 3x3 'same' conv of both channels of all examples in one FMA chain ---
    ws = [cw_ref[t] for t in range(9)]                 # hoisted SMEM scalar reads
    acc = ws[0] * taps_ref[0]
    for t in range(1, 9):
        acc = acc + ws[t] * taps_ref[t]                # (2, B*n, n)
    cb = cb_ref[0]
    x = jnp.maximum((acc[0] + cb) * (acc[1] + cb), 0.0)   # conv(primary)*conv(cursor), relu -> (B*n, n)

    # --- AdaptiveAvgPool2d(n/2) fused with linear1:  relu(P1 @ x_b @ (P1^T W1^T) + b1), batched ---
    t1 = jnp.dot(x, m1_ref[...], preferred_element_type=f32)                    # (B*n, n2)
    y1 = jnp.dot(p1bd_ref[...], t1, preferred_element_type=f32) + b1_ref[...]   # (B*n2, n2)
    y1 = jnp.maximum(y1, 0.0)

    # --- AdaptiveAvgPool2d(n/4) fused with linear2 ---
    t2 = jnp.dot(y1, m2_ref[...], preferred_element_type=f32)                   # (B*n2, n4)
    y2 = jnp.dot(p2bd_ref[...], t2, preferred_element_type=f32) + b2_ref[...]   # (B*n4, n4)
    y2 = jnp.maximum(y2, 0.0)

    # --- linear3 on row-major flatten of each example: per-action multiply-reduce, then one
    #     block-sum matmul gives (B, A) logits.  No in-kernel reshape, no per-example loop. ---
    lane = jax.lax.broadcasted_iota(jnp.int32, (1, n_actions), 1)
    pre = jnp.zeros((y2.shape[0], n_actions), f32)                              # (B*n4, A)
    for a in range(n_actions):
        s = jnp.sum(y2 * w3t_ref[a], axis=1, keepdims=True)                     # (B*n4, 1)
        pre = pre + jnp.where(lane == a, s, 0.0)
    logits = jnp.dot(ssum_ref[...], pre, preferred_element_type=f32) + b3_ref[...]   # (B, A)

    # --- Softmax over actions (per example) ---
    m = jnp.max(logits, axis=-1, keepdims=True)
    e = jnp.exp(logits - m)
    out_ref[...] = e / jnp.sum(e, axis=-1, keepdims=True)


def _pool_matrix(out_dim, in_dim):
    # P @ x averages consecutive row pairs (in_dim == 2 * out_dim) -> AdaptiveAvgPool2d rows.
    idx = jnp.arange(out_dim)
    p = jnp.zeros((out_dim, in_dim), jnp.float32)
    p = p.at[idx, 2 * idx].set(0.5)
    p = p.at[idx, 2 * idx + 1].set(0.5)
    return p


def _conv_taps(primary, cursor, n):
    # taps[3*di+dj, 0, b*n:(b+1)*n, :] = primary_padded[b, di:di+n, dj:dj+n]
    # taps[3*di+dj, 1, b*n:(b+1)*n, :] = cursor_padded [b, di:di+n, dj:dj+n]
    B = primary.shape[0]
    xp = jnp.pad(primary.astype(jnp.float32), ((0, 0), (1, 1), (1, 1)))
    yp = jnp.pad(cursor.astype(jnp.float32), ((0, 0), (1, 1), (1, 1)))
    taps = []
    for di in range(3):
        for dj in range(3):
            tp = xp[:, di:di + n, dj:dj + n].reshape(B * n, n)
            tc = yp[:, di:di + n, dj:dj + n].reshape(B * n, n)
            taps.append(jnp.stack([tp, tc], axis=0))
    return jnp.stack(taps, axis=0)                    # (9, 2, B*n, n)


def dqn1_forward_batched(primary, cursor, params):
    B, n, _ = primary.shape
    n2, n4 = n // 2, n // 4
    n_actions = params["b3"].shape[0]

    # Host-side glue (all tiny): aligned conv taps + batched/fused weight matrices.
    taps = _conv_taps(primary, cursor, n)
    p1 = _pool_matrix(n2, n)
    p2 = _pool_matrix(n4, n2)
    eye_b = jnp.eye(B, dtype=jnp.float32)
    m1 = p1.T @ params["w1"].astype(jnp.float32).T                       # (n, n2)
    m2 = p2.T @ params["w2"].astype(jnp.float32).T                       # (n2, n4)
    p1bd = jnp.kron(eye_b, p1)                                           # (B*n2, B*n)
    p2bd = jnp.kron(eye_b, p2)                                           # (B*n4, B*n2)
    ssum = jnp.kron(eye_b, jnp.ones((1, n4), jnp.float32))               # (B, B*n4)
    w3t = jnp.tile(params["w3"].astype(jnp.float32).reshape(n_actions, n4, n4),
                   (1, B, 1))                                            # (A, B*n4, n4)
    cw = params["cw"].astype(jnp.float32).reshape(9)
    cb = params["cb"].astype(jnp.float32).reshape(1)
    b1 = params["b1"].astype(jnp.float32).reshape(1, n2)
    b2 = params["b2"].astype(jnp.float32).reshape(1, n4)
    b3 = params["b3"].astype(jnp.float32).reshape(1, n_actions)

    smem = pl.BlockSpec(memory_space=pltpu.MemorySpace.SMEM)

    def vfull(shape):
        zeros = (0,) * len(shape)
        return pl.BlockSpec(shape, lambda i, z=zeros: z)

    out = pl.pallas_call(
        _dqn1_kernel,
        out_shape=jax.ShapeDtypeStruct((B, n_actions), jnp.float32),
        grid=(1,),                                  # whole batch in a single grid step
        in_specs=[
            smem, smem,
            vfull(taps.shape),
            vfull(m1.shape), vfull(p1bd.shape), vfull(b1.shape),
            vfull(m2.shape), vfull(p2bd.shape), vfull(b2.shape),
            vfull(w3t.shape), vfull(ssum.shape), vfull(b3.shape),
        ],
        out_specs=pl.BlockSpec((B, n_actions), lambda i: (0, 0)),
        compiler_params=pltpu.CompilerParams(
            dimension_semantics=("arbitrary",)),
    )(cw, cb, taps, m1, p1bd, b1, m2, p2bd, b2, w3t, ssum, b3)
    return out


def dqn1_forward(primary, cursor, params):
    # Single-state forward, matching DQN1.forward(primary, cursor) semantics.
    return dqn1_forward_batched(primary[None], cursor[None], params)[0]


def dqn1_reference(primary, cursor, params):
    # Pure-JAX reference of the PyTorch forward (unfused) for validation.
    n = primary.shape[0]
    n2, n4 = n // 2, n // 4

    def conv(z):
        zp = jnp.pad(z, 1)
        o = jnp.zeros_like(z)
        for di in range(3):
            for dj in range(3):
                o = o + params["cw"][di, dj] * zp[di:di + n, dj:dj + n]
        return o + params["cb"][0]

    x = conv(primary) * conv(cursor)
    x = jax.nn.relu(x)
    x = x.reshape(n2, 2, n2, 2).mean(axis=(1, 3))
    x = jax.nn.relu(x)
    x = x @ params["w1"].T + params["b1"]
    x = jax.nn.relu(x)
    x = x.reshape(n4, 2, n4, 2).mean(axis=(1, 3))
    x = jax.nn.relu(x)
    x = x @ params["w2"].T + params["b2"]
    x = jax.nn.relu(x)
    logits = x.reshape(-1) @ params["w3"].T + params["b3"]
    return jax.nn.softmax(logits)


if __name__ == "__main__":
    n, n_actions, batch = 16, 4, 8        # DQN1(n=16, n_actions=4): n2=8, n4=4
    n2, n4 = n // 2, n // 4

    key = jax.random.PRNGKey(0)
    ks = jax.random.split(key, 10)
    params = {
        "cw": 0.3 * jax.random.normal(ks[0], (3, 3), jnp.float32),          # Conv2d(1,1,3) weight
        "cb": 0.1 * jax.random.normal(ks[1], (1,), jnp.float32),            # Conv2d bias
        "w1": 0.2 * jax.random.normal(ks[2], (n2, n2), jnp.float32),        # Linear(n2, n2)
        "b1": 0.1 * jax.random.normal(ks[3], (n2,), jnp.float32),
        "w2": 0.2 * jax.random.normal(ks[4], (n4, n4), jnp.float32),        # Linear(n4, n4)
        "b2": 0.1 * jax.random.normal(ks[5], (n4,), jnp.float32),
        "w3": 0.2 * jax.random.normal(ks[6], (n_actions, n4 * n4), jnp.float32),  # Linear(n4**2, A)
        "b3": 0.1 * jax.random.normal(ks[7], (n_actions,), jnp.float32),
    }
    primary = jax.random.normal(ks[8], (batch, n, n), jnp.float32)
    cursor = jax.random.normal(ks[9], (batch, n, n), jnp.float32)

    fwd = jax.jit(dqn1_forward_batched)
    out = jax.block_until_ready(fwd(primary, cursor, params))
    ref = jnp.stack([dqn1_reference(primary[i], cursor[i], params) for i in range(batch)])

    assert out.shape == (batch, n_actions)
    assert jnp.allclose(jnp.sum(out, axis=-1), 1.0, atol=1e-5)
    assert jnp.allclose(out, ref, atol=2e-5, rtol=2e-5), (out, ref)
    print("KERNEL_OK")
</pallas_src>

<mosaic_0001>
module attributes {stable_mosaic.version = 11 : i64} {
  func.func @_dqn1_kernel(%arg0: i32, %arg1: memref<9xf32, #tpu.memory_space<smem>>, %arg2: memref<1xf32, #tpu.memory_space<smem>>, %arg3: memref<9x2x128x16xf32, #tpu.memory_space<vmem>>, %arg4: memref<16x8xf32, #tpu.memory_space<vmem>>, %arg5: memref<64x128xf32, #tpu.memory_space<vmem>>, %arg6: memref<1x8xf32, #tpu.memory_space<vmem>>, %arg7: memref<8x4xf32, #tpu.memory_space<vmem>>, %arg8: memref<32x64xf32, #tpu.memory_space<vmem>>, %arg9: memref<1x4xf32, #tpu.memory_space<vmem>>, %arg10: memref<4x32x4xf32, #tpu.memory_space<vmem>>, %arg11: memref<8x32xf32, #tpu.memory_space<vmem>>, %arg12: memref<1x4xf32, #tpu.memory_space<vmem>>, %arg13: memref<8x4xf32, #tpu.memory_space<vmem>>) attributes {dimension_semantics = [#tpu.dimension_semantics<arbitrary>], iteration_bounds = array<i64: 1>, scalar_prefetch = 0 : i64, scratch_operands = 0 : i64, tpu.core_type = #tpu.core_type<tc>, window_params = [{transform_indices = @transform_0, window_bounds = array<i64: 9>}, {transform_indices = @transform_1, window_bounds = array<i64: 1>}, {pipeline_mode = #tpu.pipeline_mode<synchronous>, transform_indices = @transform_2, window_bounds = array<i64: 9, 2, 128, 16>}, {pipeline_mode = #tpu.pipeline_mode<synchronous>, transform_indices = @transform_3, window_bounds = array<i64: 16, 8>}, {pipeline_mode = #tpu.pipeline_mode<synchronous>, transform_indices = @transform_4, window_bounds = array<i64: 64, 128>}, {pipeline_mode = #tpu.pipeline_mode<synchronous>, transform_indices = @transform_5, window_bounds = array<i64: 1, 8>}, {pipeline_mode = #tpu.pipeline_mode<synchronous>, transform_indices = @transform_6, window_bounds = array<i64: 8, 4>}, {pipeline_mode = #tpu.pipeline_mode<synchronous>, transform_indices = @transform_7, window_bounds = array<i64: 32, 64>}, {pipeline_mode = #tpu.pipeline_mode<synchronous>, transform_indices = @transform_8, window_bounds = array<i64: 1, 4>}, {pipeline_mode = #tpu.pipeline_mode<synchronous>, transform_indices = @transform_9, window_bounds = array<i64: 4, 32, 4>}, {pipeline_mode = #tpu.pipeline_mode<synchronous>, transform_indices = @transform_10, window_bounds = array<i64: 8, 32>}, {pipeline_mode = #tpu.pipeline_mode<synchronous>, transform_indices = @transform_11, window_bounds = array<i64: 1, 4>}, {pipeline_mode = #tpu.pipeline_mode<synchronous>, transform_indices = @transform_12, window_bounds = array<i64: 8, 4>}]} {
    %c0 = arith.constant 0 : index
    %0 = memref.load %arg1[%c0] : memref<9xf32, #tpu.memory_space<smem>>
    %c1 = arith.constant 1 : index
    %1 = memref.load %arg1[%c1] : memref<9xf32, #tpu.memory_space<smem>>
    %c2 = arith.constant 2 : index
    %2 = memref.load %arg1[%c2] : memref<9xf32, #tpu.memory_space<smem>>
    %c3 = arith.constant 3 : index
    %3 = memref.load %arg1[%c3] : memref<9xf32, #tpu.memory_space<smem>>
    %c4 = arith.constant 4 : index
    %4 = memref.load %arg1[%c4] : memref<9xf32, #tpu.memory_space<smem>>
    %c5 = arith.constant 5 : index
    %5 = memref.load %arg1[%c5] : memref<9xf32, #tpu.memory_space<smem>>
    %c6 = arith.constant 6 : index
    %6 = memref.load %arg1[%c6] : memref<9xf32, #tpu.memory_space<smem>>
    %c7 = arith.constant 7 : index
    %7 = memref.load %arg1[%c7] : memref<9xf32, #tpu.memory_space<smem>>
    %c8 = arith.constant 8 : index
    %8 = memref.load %arg1[%c8] : memref<9xf32, #tpu.memory_space<smem>>
    %c0_0 = arith.constant 0 : index
    %c0_1 = arith.constant 0 : index
    %c0_2 = arith.constant 0 : index
    %c0_3 = arith.constant 0 : index
    %9 = vector.load %arg3[%c0_0, %c0_1, %c0_2, %c0_3] : memref<9x2x128x16xf32, #tpu.memory_space<vmem>>, vector<1x2x128x16xf32>
    %10 = vector.shape_cast %9 : vector<1x2x128x16xf32> to vector<2x128x16xf32>
    %11 = vector.broadcast %0 : f32 to vector<2x128x16xf32>
    %12 = arith.mulf %11, %10 : vector<2x128x16xf32>
    %c1_4 = arith.constant 1 : index
    %c0_5 = arith.constant 0 : index
    %c0_6 = arith.constant 0 : index
    %c0_7 = arith.constant 0 : index
    %13 = vector.load %arg3[%c1_4, %c0_5, %c0_6, %c0_7] : memref<9x2x128x16xf32, #tpu.memory_space<vmem>>, vector<1x2x128x16xf32>
    %14 = vector.shape_cast %13 : vector<1x2x128x16xf32> to vector<2x128x16xf32>
    %15 = vector.broadcast %1 : f32 to vector<2x128x16xf32>
    %16 = arith.mulf %15, %14 : vector<2x128x16xf32>
    %17 = arith.addf %12, %16 : vector<2x128x16xf32>
    %c2_8 = arith.constant 2 : index
    %c0_9 = arith.constant 0 : index
    %c0_10 = arith.constant 0 : index
    %c0_11 = arith.constant 0 : index
    %18 = vector.load %arg3[%c2_8, %c0_9, %c0_10, %c0_11] : memref<9x2x128x16xf32, #tpu.memory_space<vmem>>, vector<1x2x128x16xf32>
    %19 = vector.shape_cast %18 : vector<1x2x128x16xf32> to vector<2x128x16xf32>
    %20 = vector.broadcast %2 : f32 to vector<2x128x16xf32>
    %21 = arith.mulf %20, %19 : vector<2x128x16xf32>
    %22 = arith.addf %17, %21 : vector<2x128x16xf32>
    %c3_12 = arith.constant 3 : index
    %c0_13 = arith.constant 0 : index
    %c0_14 = arith.constant 0 : index
    %c0_15 = arith.constant 0 : index
    %23 = vector.load %arg3[%c3_12, %c0_13, %c0_14, %c0_15] : memref<9x2x128x16xf32, #tpu.memory_space<vmem>>, vector<1x2x128x16xf32>
    %24 = vector.shape_cast %23 : vector<1x2x128x16xf32> to vector<2x128x16xf32>
    %25 = vector.broadcast %3 : f32 to vector<2x128x16xf32>
    %26 = arith.mulf %25, %24 : vector<2x128x16xf32>
    %27 = arith.addf %22, %26 : vector<2x128x16xf32>
    %c4_16 = arith.constant 4 : index
    %c0_17 = arith.constant 0 : index
    %c0_18 = arith.constant 0 : index
    %c0_19 = arith.constant 0 : index
    %28 = vector.load %arg3[%c4_16, %c0_17, %c0_18, %c0_19] : memref<9x2x128x16xf32, #tpu.memory_space<vmem>>, vector<1x2x128x16xf32>
    %29 = vector.shape_cast %28 : vector<1x2x128x16xf32> to vector<2x128x16xf32>
    %30 = vector.broadcast %4 : f32 to vector<2x128x16xf32>
    %31 = arith.mulf %30, %29 : vector<2x128x16xf32>
    %32 = arith.addf %27, %31 : vector<2x128x16xf32>
    %c5_20 = arith.constant 5 : index
    %c0_21 = arith.constant 0 : index
    %c0_22 = arith.constant 0 : index
    %c0_23 = arith.constant 0 : index
    %33 = vector.load %arg3[%c5_20, %c0_21, %c0_22, %c0_23] : memref<9x2x128x16xf32, #tpu.memory_space<vmem>>, vector<1x2x128x16xf32>
    %34 = vector.shape_cast %33 : vector<1x2x128x16xf32> to vector<2x128x16xf32>
    %35 = vector.broadcast %5 : f32 to vector<2x128x16xf32>
    %36 = arith.mulf %35, %34 : vector<2x128x16xf32>
    %37 = arith.addf %32, %36 : vector<2x128x16xf32>
    %c6_24 = arith.constant 6 : index
    %c0_25 = arith.constant 0 : index
    %c0_26 = arith.constant 0 : index
    %c0_27 = arith.constant 0 : index
    %38 = vector.load %arg3[%c6_24, %c0_25, %c0_26, %c0_27] : memref<9x2x128x16xf32, #tpu.memory_space<vmem>>, vector<1x2x128x16xf32>
    %39 = vector.shape_cast %38 : vector<1x2x128x16xf32> to vector<2x128x16xf32>
    %40 = vector.broadcast %6 : f32 to vector<2x128x16xf32>
    %41 = arith.mulf %40, %39 : vector<2x128x16xf32>
    %42 = arith.addf %37, %41 : vector<2x128x16xf32>
    %c7_28 = arith.constant 7 : index
    %c0_29 = arith.constant 0 : index
    %c0_30 = arith.constant 0 : index
    %c0_31 = arith.constant 0 : index
    %43 = vector.load %arg3[%c7_28, %c0_29, %c0_30, %c0_31] : memref<9x2x128x16xf32, #tpu.memory_space<vmem>>, vector<1x2x128x16xf32>
    %44 = vector.shape_cast %43 : vector<1x2x128x16xf32> to vector<2x128x16xf32>
    %45 = vector.broadcast %7 : f32 to vector<2x128x16xf32>
    %46 = arith.mulf %45, %44 : vector<2x128x16xf32>
    %47 = arith.addf %42, %46 : vector<2x128x16xf32>
    %c8_32 = arith.constant 8 : index
    %c0_33 = arith.constant 0 : index
    %c0_34 = arith.constant 0 : index
    %c0_35 = arith.constant 0 : index
    %48 = vector.load %arg3[%c8_32, %c0_33, %c0_34, %c0_35] : memref<9x2x128x16xf32, #tpu.memory_space<vmem>>, vector<1x2x128x16xf32>
    %49 = vector.shape_cast %48 : vector<1x2x128x16xf32> to vector<2x128x16xf32>
    %50 = vector.broadcast %8 : f32 to vector<2x128x16xf32>
    %51 = arith.mulf %50, %49 : vector<2x128x16xf32>
    %52 = arith.addf %47, %51 : vector<2x128x16xf32>
    %c0_36 = arith.constant 0 : index
    %53 = memref.load %arg2[%c0_36] : memref<1xf32, #tpu.memory_space<smem>>
    %54 = vector.extract_strided_slice %52 {offsets = [0, 0, 0], sizes = [1, 128, 16], strides = [1, 1, 1]} : vector<2x128x16xf32> to vector<1x128x16xf32>
    %55 = vector.shape_cast %54 : vector<1x128x16xf32> to vector<128x16xf32>
    %56 = vector.broadcast %53 : f32 to vector<128x16xf32>
    %57 = arith.addf %55, %56 : vector<128x16xf32>
    %58 = vector.extract_strided_slice %52 {offsets = [1, 0, 0], sizes = [1, 128, 16], strides = [1, 1, 1]} : vector<2x128x16xf32> to vector<1x128x16xf32>
    %59 = vector.shape_cast %58 : vector<1x128x16xf32> to vector<128x16xf32>
    %60 = vector.broadcast %53 : f32 to vector<128x16xf32>
    %61 = arith.addf %59, %60 : vector<128x16xf32>
    %62 = arith.mulf %57, %61 : vector<128x16xf32>
    %cst = arith.constant 0.000000e+00 : f32
    %63 = vector.broadcast %cst : f32 to vector<128x16xf32>
    %64 = arith.maximumf %62, %63 : vector<128x16xf32>
    %c0_37 = arith.constant 0 : index
    %c0_38 = arith.constant 0 : index
    %65 = vector.load %arg4[%c0_37, %c0_38] : memref<16x8xf32, #tpu.memory_space<vmem>>, vector<16x8xf32>
    %cst_39 = arith.constant dense<0.000000e+00> : vector<128x8xf32>
    %66 = tpu.matmul %64, %65, %cst_39 {dimension_numbers = #tpu.dot_dimension_numbers<[1], [0], [0], [1], [0, 0, 1, 1], [], []>} : vector<128x16xf32>, vector<16x8xf32>, vector<128x8xf32> -> vector<128x8xf32>
    %c0_40 = arith.constant 0 : index
    %c0_41 = arith.constant 0 : index
    %67 = vector.load %arg5[%c0_40, %c0_41] : memref<64x128xf32, #tpu.memory_space<vmem>>, vector<64x128xf32>
    %cst_42 = arith.constant dense<0.000000e+00> : vector<64x8xf32>
    %68 = tpu.matmul %67, %66, %cst_42 {dimension_numbers = #tpu.dot_dimension_numbers<[1], [0], [0], [1], [0, 0, 1, 1], [], []>} : vector<64x128xf32>, vector<128x8xf32>, vector<64x8xf32> -> vector<64x8xf32>
    %c0_43 = arith.constant 0 : index
    %c0_44 = arith.constant 0 : index
    %69 = vector.load %arg6[%c0_43, %c0_44] : memref<1x8xf32, #tpu.memory_space<vmem>>, vector<1x8xf32>
    %70 = vector.broadcast %69 : vector<1x8xf32> to vector<64x8xf32>
    %71 = arith.addf %68, %70 : vector<64x8xf32>
    %cst_45 = arith.constant 0.000000e+00 : f32
    %72 = vector.broadcast %cst_45 : f32 to vector<64x8xf32>
    %73 = arith.maximumf %71, %72 : vector<64x8xf32>
    %c0_46 = arith.constant 0 : index
    %c0_47 = arith.constant 0 : index
    %74 = vector.load %arg7[%c0_46, %c0_47] : memref<8x4xf32, #tpu.memory_space<vmem>>, vector<8x4xf32>
    %cst_48 = arith.constant dense<0.000000e+00> : vector<64x4xf32>
    %75 = tpu.matmul %73, %74, %cst_48 {dimension_numbers = #tpu.dot_dimension_numbers<[1], [0], [0], [1], [0, 0, 1, 1], [], []>} : vector<64x8xf32>, vector<8x4xf32>, vector<64x4xf32> -> vector<64x4xf32>
    %c0_49 = arith.constant 0 : index
    %c0_50 = arith.constant 0 : index
    %76 = vector.load %arg8[%c0_49, %c0_50] : memref<32x64xf32, #tpu.memory_space<vmem>>, vector<32x64xf32>
    %cst_51 = arith.constant dense<0.000000e+00> : vector<32x4xf32>
    %77 = tpu.matmul %76, %75, %cst_51 {dimension_numbers = #tpu.dot_dimension_numbers<[1], [0], [0], [1], [0, 0, 1, 1], [], []>} : vector<32x64xf32>, vector<64x4xf32>, vector<32x4xf32> -> vector<32x4xf32>
    %c0_52 = arith.constant 0 : index
    %c0_53 = arith.constant 0 : index
    %78 = vector.load %arg9[%c0_52, %c0_53] : memref<1x4xf32, #tpu.memory_space<vmem>>, vector<1x4xf32>
    %79 = vector.broadcast %78 : vector<1x4xf32> to vector<32x4xf32>
    %80 = arith.addf %77, %79 : vector<32x4xf32>
    %cst_54 = arith.constant 0.000000e+00 : f32
    %81 = vector.broadcast %cst_54 : f32 to vector<32x4xf32>
    %82 = arith.maximumf %80, %81 : vector<32x4xf32>
    %83 = tpu.iota {dimensions = array<i32: 1>} : vector<1x4xi32>
    %cst_55 = arith.constant 0.000000e+00 : f32
    %84 = vector.broadcast %cst_55 : f32 to vector<32x4xf32>
    %c0_56 = arith.constant 0 : index
    %c0_57 = arith.constant 0 : index
    %c0_58 = arith.constant 0 : index
    %85 = vector.load %arg10[%c0_56, %c0_57, %c0_58] : memref<4x32x4xf32, #tpu.memory_space<vmem>>, vector<1x32x4xf32>
    %86 = vector.shape_cast %85 : vector<1x32x4xf32> to vector<32x4xf32>
    %87 = arith.mulf %82, %86 : vector<32x4xf32>
    %cst_59 = arith.constant dense<0.000000e+00> : vector<32xf32>
    %88 = vector.multi_reduction <add>, %87, %cst_59 [1] : vector<32x4xf32> to vector<32xf32>
    %89 = vector.shape_cast %88 : vector<32xf32> to vector<32x1xf32>
    %c0_i32 = arith.constant 0 : i32
    %90 = vector.broadcast %c0_i32 : i32 to vector<1x4xi32>
    %91 = arith.cmpi eq, %83, %90 : vector<1x4xi32>
    %cst_60 = arith.constant 0.000000e+00 : f32
    %92 = vector.shape_cast %91 : vector<1x4xi1> to vector<1x4xi1>
    %93 = vector.broadcast %92 : vector<1x4xi1> to vector<32x4xi1>
    %94 = vector.shape_cast %89 : vector<32x1xf32> to vector<32x1xf32>
    %95 = vector.broadcast %94 : vector<32x1xf32> to vector<32x4xf32>
    %96 = vector.broadcast %cst_60 : f32 to vector<32x4xf32>
    %97 = arith.select %93, %95, %96 : vector<32x4xi1>, vector<32x4xf32>
    %98 = arith.addf %84, %97 : vector<32x4xf32>
    %c1_61 = arith.constant 1 : index
    %c0_62 = arith.constant 0 : index
    %c0_63 = arith.constant 0 : index
    %99 = vector.load %arg10[%c1_61, %c0_62, %c0_63] : memref<4x32x4xf32, #tpu.memory_space<vmem>>, vector<1x32x4xf32>
    %100 = vector.shape_cast %99 : vector<1x32x4xf32> to vector<32x4xf32>
    %101 = arith.mulf %82, %100 : vector<32x4xf32>
    %cst_64 = arith.constant dense<0.000000e+00> : vector<32xf32>
    %102 = vector.multi_reduction <add>, %101, %cst_64 [1] : vector<32x4xf32> to vector<32xf32>
    %103 = vector.shape_cast %102 : vector<32xf32> to vector<32x1xf32>
    %c1_i32 = arith.constant 1 : i32
    %104 = vector.broadcast %c1_i32 : i32 to vector<1x4xi32>
    %105 = arith.cmpi eq, %83, %104 : vector<1x4xi32>
    %cst_65 = arith.constant 0.000000e+00 : f32
    %106 = vector.shape_cast %105 : vector<1x4xi1> to vector<1x4xi1>
    %107 = vector.broadcast %106 : vector<1x4xi1> to vector<32x4xi1>
    %108 = vector.shape_cast %103 : vector<32x1xf32> to vector<32x1xf32>
    %109 = vector.broadcast %108 : vector<32x1xf32> to vector<32x4xf32>
    %110 = vector.broadcast %cst_65 : f32 to vector<32x4xf32>
    %111 = arith.select %107, %109, %110 : vector<32x4xi1>, vector<32x4xf32>
    %112 = arith.addf %98, %111 : vector<32x4xf32>
    %c2_66 = arith.constant 2 : index
    %c0_67 = arith.constant 0 : index
    %c0_68 = arith.constant 0 : index
    %113 = vector.load %arg10[%c2_66, %c0_67, %c0_68] : memref<4x32x4xf32, #tpu.memory_space<vmem>>, vector<1x32x4xf32>
    %114 = vector.shape_cast %113 : vector<1x32x4xf32> to vector<32x4xf32>
    %115 = arith.mulf %82, %114 : vector<32x4xf32>
    %cst_69 = arith.constant dense<0.000000e+00> : vector<32xf32>
    %116 = vector.multi_reduction <add>, %115, %cst_69 [1] : vector<32x4xf32> to vector<32xf32>
    %117 = vector.shape_cast %116 : vector<32xf32> to vector<32x1xf32>
    %c2_i32 = arith.constant 2 : i32
    %118 = vector.broadcast %c2_i32 : i32 to vector<1x4xi32>
    %119 = arith.cmpi eq, %83, %118 : vector<1x4xi32>
    %cst_70 = arith.constant 0.000000e+00 : f32
    %120 = vector.shape_cast %119 : vector<1x4xi1> to vector<1x4xi1>
    %121 = vector.broadcast %120 : vector<1x4xi1> to vector<32x4xi1>
    %122 = vector.shape_cast %117 : vector<32x1xf32> to vector<32x1xf32>
    %123 = vector.broadcast %122 : vector<32x1xf32> to vector<32x4xf32>
    %124 = vector.broadcast %cst_70 : f32 to vector<32x4xf32>
    %125 = arith.select %121, %123, %124 : vector<32x4xi1>, vector<32x4xf32>
    %126 = arith.addf %112, %125 : vector<32x4xf32>
    %c3_71 = arith.constant 3 : index
    %c0_72 = arith.constant 0 : index
    %c0_73 = arith.constant 0 : index
    %127 = vector.load %arg10[%c3_71, %c0_72, %c0_73] : memref<4x32x4xf32, #tpu.memory_space<vmem>>, vector<1x32x4xf32>
    %128 = vector.shape_cast %127 : vector<1x32x4xf32> to vector<32x4xf32>
    %129 = arith.mulf %82, %128 : vector<32x4xf32>
    %cst_74 = arith.constant dense<0.000000e+00> : vector<32xf32>
    %130 = vector.multi_reduction <add>, %129, %cst_74 [1] : vector<32x4xf32> to vector<32xf32>
    %131 = vector.shape_cast %130 : vector<32xf32> to vector<32x1xf32>
    %c3_i32 = arith.constant 3 : i32
    %132 = vector.broadcast %c3_i32 : i32 to vector<1x4xi32>
    %133 = arith.cmpi eq, %83, %132 : vector<1x4xi32>
    %cst_75 = arith.constant 0.000000e+00 : f32
    %134 = vector.shape_cast %133 : vector<1x4xi1> to vector<1x4xi1>
    %135 = vector.broadcast %134 : vector<1x4xi1> to vector<32x4xi1>
    %136 = vector.shape_cast %131 : vector<32x1xf32> to vector<32x1xf32>
    %137 = vector.broadcast %136 : vector<32x1xf32> to vector<32x4xf32>
    %138 = vector.broadcast %cst_75 : f32 to vector<32x4xf32>
    %139 = arith.select %135, %137, %138 : vector<32x4xi1>, vector<32x4xf32>
    %140 = arith.addf %126, %139 : vector<32x4xf32>
    %c0_76 = arith.constant 0 : index
    %c0_77 = arith.constant 0 : index
    %141 = vector.load %arg11[%c0_76, %c0_77] : memref<8x32xf32, #tpu.memory_space<vmem>>, vector<8x32xf32>
    %cst_78 = arith.constant dense<0.000000e+00> : vector<8x4xf32>
    %142 = tpu.matmul %141, %140, %cst_78 {dimension_numbers = #tpu.dot_dimension_numbers<[1], [0], [0], [1], [0, 0, 1, 1], [], []>} : vector<8x32xf32>, vector<32x4xf32>, vector<8x4xf32> -> vector<8x4xf32>
    %c0_79 = arith.constant 0 : index
    %c0_80 = arith.constant 0 : index
    %143 = vector.load %arg12[%c0_79, %c0_80] : memref<1x4xf32, #tpu.memory_space<vmem>>, vector<1x4xf32>
    %144 = vector.broadcast %143 : vector<1x4xf32> to vector<8x4xf32>
    %145 = arith.addf %142, %144 : vector<8x4xf32>
    %cst_81 = arith.constant dense<0xFF800000> : vector<8xf32>
    %146 = vector.multi_reduction <maximumf>, %145, %cst_81 [1] : vector<8x4xf32> to vector<8xf32>
    %147 = vector.shape_cast %146 : vector<8xf32> to vector<8x1xf32>
    %148 = vector.broadcast %147 : vector<8x1xf32> to vector<8x4xf32>
    %149 = arith.subf %145, %148 : vector<8x4xf32>
    %150 = math.exp %149 : vector<8x4xf32>
    %cst_82 = arith.constant dense<0.000000e+00> : vector<8xf32>
    %151 = vector.multi_reduction <add>, %150, %cst_82 [1] : vector<8x4xf32> to vector<8xf32>
    %152 = vector.shape_cast %151 : vector<8xf32> to vector<8x1xf32>
    %153 = vector.broadcast %152 : vector<8x1xf32> to vector<8x4xf32>
    %154 = arith.divf %150, %153 : vector<8x4xf32>
    %c0_83 = arith.constant 0 : index
    %c0_84 = arith.constant 0 : index
    %155 = vector.load %arg13[%c0_83, %c0_84] : memref<8x4xf32, #tpu.memory_space<vmem>>, vector<8x4xf32>
    tpu.vector_store %arg13[%c0_83, %c0_84], %154 {strides = array<i32>} : memref<8x4xf32, #tpu.memory_space<vmem>>, vector<8x4xf32>,
    return
  }
  func.func @transform_0(%arg0: i32) -> i32 {
    %c0_i32 = arith.constant 0 : i32
    %c0_i32_0 = arith.constant 0 : i32
    return %c0_i32 : i32
  }
  func.func @transform_1(%arg0: i32) -> i32 {
    %c0_i32 = arith.constant 0 : i32
    %c0_i32_0 = arith.constant 0 : i32
    return %c0_i32 : i32
  }
  func.func @transform_2(%arg0: i32) -> (i32, i32, i32, i32) {
    %c0_i32 = arith.constant 0 : i32
    %c0_i32_0 = arith.constant 0 : i32
    %c0_i32_1 = arith.constant 0 : i32
    %c0_i32_2 = arith.constant 0 : i32
    %c0_i32_3 = arith.constant 0 : i32
    return %c0_i32, %c0_i32_0, %c0_i32_1, %c0_i32_2 : i32, i32, i32, i32
  }
  func.func @transform_3(%arg0: i32) -> (i32, i32) {
    %c0_i32 = arith.constant 0 : i32
    %c0_i32_0 = arith.constant 0 : i32
    %c0_i32_1 = arith.constant 0 : i32
    return %c0_i32, %c0_i32_0 : i32, i32
  }
  func.func @transform_4(%arg0: i32) -> (i32, i32) {
    %c0_i32 = arith.constant 0 : i32
    %c0_i32_0 = arith.constant 0 : i32
    %c0_i32_1 = arith.constant 0 : i32
    return %c0_i32, %c0_i32_0 : i32, i32
  }
  func.func @transform_5(%arg0: i32) -> (i32, i32) {
    %c0_i32 = arith.constant 0 : i32
    %c0_i32_0 = arith.constant 0 : i32
    %c0_i32_1 = arith.constant 0 : i32
    return %c0_i32, %c0_i32_0 : i32, i32
  }
  func.func @transform_6(%arg0: i32) -> (i32, i32) {
    %c0_i32 = arith.constant 0 : i32
    %c0_i32_0 = arith.constant 0 : i32
    %c0_i32_1 = arith.constant 0 : i32
    return %c0_i32, %c0_i32_0 : i32, i32
  }
  func.func @transform_7(%arg0: i32) -> (i32, i32) {
    %c0_i32 = arith.constant 0 : i32
    %c0_i32_0 = arith.constant 0 : i32
    %c0_i32_1 = arith.constant 0 : i32
    return %c0_i32, %c0_i32_0 : i32, i32
  }
  func.func @transform_8(%arg0: i32) -> (i32, i32) {
    %c0_i32 = arith.constant 0 : i32
    %c0_i32_0 = arith.constant 0 : i32
    %c0_i32_1 = arith.constant 0 : i32
    return %c0_i32, %c0_i32_0 : i32, i32
  }
  func.func @transform_9(%arg0: i32) -> (i32, i32, i32) {
    %c0_i32 = arith.constant 0 : i32
    %c0_i32_0 = arith.constant 0 : i32
    %c0_i32_1 = arith.constant 0 : i32
    %c0_i32_2 = arith.constant 0 : i32
    return %c0_i32, %c0_i32_0, %c0_i32_1 : i32, i32, i32
  }
  func.func @transform_10(%arg0: i32) -> (i32, i32) {
    %c0_i32 = arith.constant 0 : i32
    %c0_i32_0 = arith.constant 0 : i32
    %c0_i32_1 = arith.constant 0 : i32
    return %c0_i32, %c0_i32_0 : i32, i32
  }
  func.func @transform_11(%arg0: i32) -> (i32, i32) {
    %c0_i32 = arith.constant 0 : i32
    %c0_i32_0 = arith.constant 0 : i32
    %c0_i32_1 = arith.constant 0 : i32
    return %c0_i32, %c0_i32_0 : i32, i32
  }
  func.func @transform_12(%arg0: i32) -> (i32, i32) {
    %c0_i32 = arith.constant 0 : i32
    %c0_i32_0 = arith.constant 0 : i32
    %c0_i32_1 = arith.constant 0 : i32
    return %c0_i32, %c0_i32_0 : i32, i32
  }
}

</mosaic_0001>

<bundles_post_ra>
// kernel: dqn1_forward_batched.1
= control target key start
LH: loop header
LB: loop body
LE: loop exit
PB: predicated region body
PF: predicated region fallthrough
CT: control target
= control target key end

     0   :  { %s3810_s0 = inlined_call_operand.vmem [shape: f32[9], index: 0, kind: input, shape index: {}]   ;;  %s3811_s1 = inlined_call_operand.<no memory space> [shape: f32[1], index: 1, kind: input, shape index: {}]   ;;  %s3812_s2 = inlined_call_operand.vmem [shape: f32[9,2,128,16], index: 2, kind: input, shape index: {}]   ;;  %s3813_s3 = inlined_call_operand.vmem [shape: f32[16,8], index: 3, kind: input, shape index: {}]   ;;  %s3814_s4 = inlined_call_operand.vmem [shape: f32[64,128], index: 4, kind: input, shape index: {}]   ;;  %s3815_s5 = inlined_call_operand.vmem [shape: f32[1,8], index: 5, kind: input, shape index: {}]   ;;  %s3816_s6 = inlined_call_operand.vmem [shape: f32[8,4], index: 6, kind: input, shape index: {}]   ;;  %s3817_s7 = inlined_call_operand.vmem [shape: f32[32,64], index: 7, kind: input, shape index: {}]   ;;  %s3818_s8 = inlined_call_operand.vmem [shape: f32[1,4], index: 8, kind: input, shape index: {}]   ;;  %s3819_s9 = inlined_call_operand.vmem [shape: f32[4,32,4], index: 9, kind: input, shape index: {}]   ;;  %s3820_s10 = inlined_call_operand.vmem [shape: f32[8,32], index: 10, kind: input, shape index: {}]   ;;  %s3821_s11 = inlined_call_operand.vmem [shape: f32[1,4], index: 11, kind: input, shape index: {}]   ;;  %s3822_s12 = inlined_call_operand.vmem [shape: f32[8,4], index: 12, kind: output, shape index: {}]  }
   0x1   :  { %3823 = sst [smem:[#allocation6_spill]] %s3822_s12 }
   0x2   :  { %18 = vsyncpa [#allocation4], 0  ;;  %s25_s23 = sshll.u32 %s3810_s0, 4  ;;  %s26_s23 = int_to_ptr.vmem [resolvable:$true] %s25_s23 }
   0x3   :  { %s2337_s24 = scalar_lea.vmem %s26_s23, 16  ;;  %p2342_p1 = scmp.lt.s32.totalorder %s26_s23, %s26_s23 }
   0x4   :  { %p2338_p0 = scmp.ne.s32.totalorder %s26_s23, %s2337_s24  ;;  %p2343_p2 = scmp.lt.s32.totalorder %s2337_s24, %s2337_s24 }
   0x6   :  { %p2344_p3 = por %p2343_p2, %p2342_p1 }
   0x8   :  { %p2345_p4 = pnand %p2344_p3, %p2338_p0 }
   0xa   :  { %2348 = shalt.err (!%p2345_p4)
}
   0xb   :  { %s2351_s25 = smov [#allocation3]  }
   0xc   :  { %28 = dma.vmem_to_smem %s26_s23, 16, %s2351_s25, [#allocation4]  }
   0xd   :  { %2349 = dma.done.wait [#allocation4], 16  }
   0xe   :  { %2350 = vsyncadd [#allocation4], 4294967280 }
   0xf   :  { %54 = sfence }
  0x10   :  { %v979_v0 = vld [vmem:[%s3813_s3] sm:$0xff]  ;;  %v980_v1 = vld [vmem:[%s3813_s3 + $0x8] sm:$0xff]  ;;  %s55_s0 = sld [smem:[#allocation3]]  ;;  %s1776_s30 = sld [smem:[#allocation3 + $0x1]]  ;;  %v2459_v10 = vstv %s3811_s1  ;;  %vm981_vm0 = vcmask 130048   ;;  %vm1304_vm1 = vcmask 64512  }
  0x11   :  { %v2271_v2 = vpack.c.bf16 %v980_v1, %v979_v0  ;;  %s1777_s13 = sld [smem:[#allocation3 + $0x2]]  ;;  %s1778_s14 = sld [smem:[#allocation3 + $0x3]]  ;;  %v64_v3 = vld [vmem:[%s3812_s2] sm:$0xff]  ;;  %v65_v32 = vld [vmem:[%s3812_s2 + $0x8] sm:$0xff]  ;;  %vm1445_vm2 = vcmask 523264   ;;  %vm1557_vm3 = vcmask 31744  }
  0x12   :  { %s1779_s15 = sld [smem:[#allocation3 + $0x4]]  ;;  %s1780_s16 = sld [smem:[#allocation3 + $0x5]]  ;;  %v80_v4 = vld [vmem:[%s3812_s2 + $0x80] sm:$0xff]  ;;  %v81_v45 = vld [vmem:[%s3812_s2 + $0x88] sm:$0xff]  ;;  %vm2353_vm4 = vmmov 0   ;;  %vm1685_vm9 = vcmask 261120  }
  0x13   :  { %2272 = vmatprep.subr.bf16.mxu0 %v2271_v2  ;;  %s2429_s17 = sld [smem:[#allocation3 + $0x6]]  ;;  %s2437_s3 = sld [smem:[#allocation3 + $0x7]]  ;;  %v1784_v5 = vld [vmem:[%s3812_s2 + $0x100] sm:$0xff]  ;;  %v1785_v46 = vld [vmem:[%s3812_s2 + $0x108] sm:$0xff] }
  0x14   :  { %2274 = vmatpush3.bf16.msra.mxu0 %v2271_v2  ;;  %s2439_s22 = sld [smem:[#allocation3 + $0x8]]  ;;  %v1800_v6 = vld [vmem:[%s3812_s2 + $0x180] sm:$0xff]  ;;  %v1801_v51 = vld [vmem:[%s3812_s2 + $0x188] sm:$0xff]  ;;  %s3824_s23 = sld [smem:[#allocation6_spill]] }
  0x15   :  { %v1816_v7 = vld [vmem:[%s3812_s2 + $0x200] sm:$0xff]  ;;  %v1817_v56 = vld [vmem:[%s3812_s2 + $0x208] sm:$0xff] }
  0x16   :  { %v1832_v8 = vld [vmem:[%s3812_s2 + $0x280] sm:$0xff]  ;;  %v2461_v11 = vstv %s55_s0  ;;  %v2463_v12 = vstv %s1776_s30  ;;  %v1833_v57 = vld [vmem:[%s3812_s2 + $0x288] sm:$0xff] }
  0x17   :  { %v1848_v9 = vld [vmem:[%s3812_s2 + $0x300] sm:$0xff]  ;;  %v97_v15 = vmul.f32 %v2461_v11, %v64_v3  ;;  %v113_v16 = vmul.f32 %v2461_v11, %v80_v4  ;;  %v163_v17 = vmul.f32 %v1784_v5, %v2463_v12  ;;  %v179_v18 = vmul.f32 %v1800_v6, %v2463_v12  ;;  %v1849_v58 = vld [vmem:[%s3812_s2 + $0x308] sm:$0xff] }
  0x18   :  { %v1864_v13 = vld [vmem:[%s3812_s2 + $0x380] sm:$0xff]  ;;  %v2484_v22 = vstv %s1777_s13  ;;  %v2486_v23 = vstv %s1778_s14  ;;  %v2488_v24 = vstv %s1779_s15  ;;  %v98_v50 = vmul.f32 %v2461_v11, %v65_v32 }
  0x19   :  { %v1880_v14 = vld [vmem:[%s3812_s2 + $0x400] sm:$0xff]  ;;  %v2490_v25 = vstv %s1780_s16  ;;  %v195_v26 = vadd.f32 %v163_v17, %v97_v15  ;;  %v211_v27 = vadd.f32 %v179_v18, %v113_v16  ;;  %v261_v28 = vmul.f32 %v1816_v7, %v2484_v22  ;;  %v1865_v63 = vld [vmem:[%s3812_s2 + $0x388] sm:$0xff] }
  0x1a   :  { %v1896_v19 = vld [vmem:[%s3812_s2 + $0x480] sm:$0xff]  ;;  %v277_v29 = vmul.f32 %v1832_v8, %v2484_v22  ;;  %v359_v33 = vmul.f32 %v1848_v9, %v2486_v23  ;;  %v375_v34 = vmul.f32 %v1864_v13, %v2486_v23  ;;  %v457_v35 = vmul.f32 %v1880_v14, %v2488_v24  ;;  %v1881_v4 = vld [vmem:[%s3812_s2 + $0x408] sm:$0xff] }
  0x1b   :  { %v1912_v20 = vld [vmem:[%s3812_s2 + $0x500] sm:$0xff]  ;;  %v473_v36 = vmul.f32 %v1896_v19, %v2488_v24  ;;  %v293_v40 = vadd.f32 %v261_v28, %v195_v26  ;;  %v2528_v47 = vstv %s2429_s17  ;;  %v2531_v48 = vstv %s2437_s3  ;;  %v1897_v5 = vld [vmem:[%s3812_s2 + $0x488] sm:$0xff] }
  0x1c   :  { %v1928_v21 = vld [vmem:[%s3812_s2 + $0x580] sm:$0xff]  ;;  %v309_v41 = vadd.f32 %v277_v29, %v211_v27  ;;  %v555_v42 = vmul.f32 %v1912_v20, %v2490_v25  ;;  %v2534_v49 = vstv %s2439_s22  ;;  %v114_v2 = vmul.f32 %v2461_v11, %v81_v45  ;;  %v1913_v6 = vld [vmem:[%s3812_s2 + $0x508] sm:$0xff] }
  0x1d   :  { %v1944_v30 = vld [vmem:[%s3812_s2 + $0x600] sm:$0xff]  ;;  %v571_v43 = vmul.f32 %v1928_v21, %v2490_v25  ;;  %v391_v52 = vadd.f32 %v359_v33, %v293_v40  ;;  %v164_v3 = vmul.f32 %v1785_v46, %v2463_v12  ;;  %v180_v7 = vmul.f32 %v1801_v51, %v2463_v12  ;;  %v1929_v14 = vld [vmem:[%s3812_s2 + $0x588] sm:$0xff]  ;;  %v1802_v51 = vld [vmem:[%s3812_s2 + $0x190] sm:$0xff] }
  0x1e   :  { %v1960_v31 = vld [vmem:[%s3812_s2 + $0x680] sm:$0xff]  ;;  %v407_v53 = vadd.f32 %v375_v34, %v309_v41  ;;  %v653_v54 = vmul.f32 %v1944_v30, %v2528_v47  ;;  %v262_v8 = vmul.f32 %v1817_v56, %v2484_v22  ;;  %v278_v9 = vmul.f32 %v1833_v57, %v2484_v22  ;;  %v1945_v19 = vld [vmem:[%s3812_s2 + $0x608] sm:$0xff]  ;;  %v1834_v57 = vld [vmem:[%s3812_s2 + $0x290] sm:$0xff] }
  0x1f   :  { %v1976_v37 = vld [vmem:[%s3812_s2 + $0x700] sm:$0xff]  ;;  %v669_v55 = vmul.f32 %v1960_v31, %v2528_v47  ;;  %v489_v0 = vadd.f32 %v457_v35, %v391_v52  ;;  %v360_v13 = vmul.f32 %v1849_v58, %v2486_v23  ;;  %v196_v17 = vadd.f32 %v164_v3, %v98_v50  ;;  %v1961_v20 = vld [vmem:[%s3812_s2 + $0x688] sm:$0xff]  ;;  %v1786_v50 = vld [vmem:[%s3812_s2 + $0x110] sm:$0xff] }
  0x20   :  { %v1992_v38 = vld [vmem:[%s3812_s2 + $0x780] sm:$0xff]  ;;  %v751_v59 = vmul.f32 %v1976_v37, %v2531_v48  ;;  %v505_v1 = vadd.f32 %v473_v36, %v407_v53  ;;  %v376_v18 = vmul.f32 %v1865_v63, %v2486_v23  ;;  %v1977_v21 = vld [vmem:[%s3812_s2 + $0x708] sm:$0xff]  ;;  %v212_v26 = vadd.f32 %v180_v7, %v114_v2  ;;  %v66_v37 = vld [vmem:[%s3812_s2 + $0x10] sm:$0xff] }
  0x21   :  { %v2008_v39 = vld [vmem:[%s3812_s2 + $0x800] sm:$0xff]  ;;  %v767_v60 = vmul.f32 %v1992_v38, %v2531_v48  ;;  %v587_v15 = vadd.f32 %v555_v42, %v489_v0  ;;  %v458_v27 = vmul.f32 %v1881_v4, %v2488_v24  ;;  %v474_v28 = vmul.f32 %v1897_v5, %v2488_v24  ;;  %v1993_v30 = vld [vmem:[%s3812_s2 + $0x788] sm:$0xff]  ;;  %v82_v42 = vld [vmem:[%s3812_s2 + $0x90] sm:$0xff] }
  0x22   :  { %v2024_v44 = vld [vmem:[%s3812_s2 + $0x880] sm:$0xff]  ;;  %v849_v61 = vmul.f32 %v2008_v39, %v2534_v49  ;;  %v603_v16 = vadd.f32 %v571_v43, %v505_v1  ;;  %v556_v29 = vmul.f32 %v1913_v6, %v2490_v25  ;;  %v294_v33 = vadd.f32 %v262_v8, %v196_v17  ;;  %v2009_v35 = vld [vmem:[%s3812_s2 + $0x808] sm:$0xff]  ;;  %v1818_v52 = vld [vmem:[%s3812_s2 + $0x210] sm:$0xff] }
  0x23   :  { %v865_v62 = vmul.f32 %v2024_v44, %v2534_v49  ;;  %v685_v31 = vadd.f32 %v653_v54, %v587_v15  ;;  %v572_v34 = vmul.f32 %v1929_v14, %v2490_v25  ;;  %v2025_v36 = vld [vmem:[%s3812_s2 + $0x888] sm:$0xff]  ;;  %v310_v38 = vadd.f32 %v278_v9, %v212_v26  ;;  %v1850_v0 = vld [vmem:[%s3812_s2 + $0x310] sm:$0xff] }
  0x24   :  { %v701_v32 = vadd.f32 %v669_v55, %v603_v16  ;;  %v654_v39 = vmul.f32 %v1945_v19, %v2528_v47  ;;  %v670_v40 = vmul.f32 %v1961_v20, %v2528_v47  ;;  %v752_v41 = vmul.f32 %v1977_v21, %v2531_v48  ;;  %v1866_v5 = vld [vmem:[%s3812_s2 + $0x390] sm:$0xff] }
  0x25   :  { %v783_v43 = vadd.f32 %v751_v59, %v685_v31  ;;  %v392_v45 = vadd.f32 %v360_v13, %v294_v33  ;;  %v768_v46 = vmul.f32 %v1993_v30, %v2531_v48  ;;  %v408_v53 = vadd.f32 %v376_v18, %v310_v38  ;;  %v1898_v9 = vld [vmem:[%s3812_s2 + $0x490] sm:$0xff] }
  0x26   :  { %v799_v44 = vadd.f32 %v767_v60, %v701_v32  ;;  %v850_v54 = vmul.f32 %v2009_v35, %v2534_v49  ;;  %v866_v55 = vmul.f32 %v2025_v36, %v2534_v49  ;;  %v99_v56 = vmul.f32 %v2461_v11, %v66_v37  ;;  %v1914_v17 = vld [vmem:[%s3812_s2 + $0x510] sm:$0xff] }
  0x27   :  { %v881_v58 = vadd.f32 %v849_v61, %v783_v43  ;;  %v490_v60 = vadd.f32 %v458_v27, %v392_v45  ;;  %v115_v63 = vmul.f32 %v2461_v11, %v82_v42  ;;  %v506_v1 = vadd.f32 %v474_v28, %v408_v53  ;;  %v1882_v61 = vld [vmem:[%s3812_s2 + $0x410] sm:$0xff] }
  0x28   :  { %v897_v59 = vadd.f32 %v865_v62, %v799_v44  ;;  %v165_v2 = vmul.f32 %v1786_v50, %v2463_v12  ;;  %v181_v3 = vmul.f32 %v1802_v51, %v2463_v12  ;;  %v263_v4 = vmul.f32 %v1818_v52, %v2484_v22  ;;  %v1930_v18 = vld [vmem:[%s3812_s2 + $0x590] sm:$0xff]  ;;  %v83_v50 = vld [vmem:[%s3812_s2 + $0x98] sm:$0xff] }
  0x29   :  { %v915_v62 = vadd.f32 %v2459_v10, %v881_v58  ;;  %v588_v7 = vadd.f32 %v556_v29, %v490_v60  ;;  %v279_v8 = vmul.f32 %v1834_v57, %v2484_v22  ;;  %v604_v13 = vadd.f32 %v572_v34, %v506_v1  ;;  %v1946_v27 = vld [vmem:[%s3812_s2 + $0x610] sm:$0xff]  ;;  %v1803_v57 = vld [vmem:[%s3812_s2 + $0x198] sm:$0xff] }
  0x2a   :  { %v931_v6 = vadd.f32 %v2459_v10, %v897_v59  ;;  %v197_v14 = vadd.f32 %v165_v2, %v99_v56  ;;  %v213_v15 = vadd.f32 %v181_v3, %v115_v63  ;;  %v361_v16 = vmul.f32 %v1850_v0, %v2486_v23  ;;  %v1962_v32 = vld [vmem:[%s3812_s2 + $0x690] sm:$0xff]  ;;  %v1787_v56 = vld [vmem:[%s3812_s2 + $0x118] sm:$0xff] }
  0x2b   :  { %v686_v20 = vadd.f32 %v654_v39, %v588_v7  ;;  %v377_v21 = vmul.f32 %v1866_v5, %v2486_v23  ;;  %v459_v26 = vmul.f32 %v1882_v61, %v2488_v24  ;;  %v702_v28 = vadd.f32 %v670_v40, %v604_v13  ;;  %v1978_v33 = vld [vmem:[%s3812_s2 + $0x710] sm:$0xff]  ;;  %v1835_v0 = vld [vmem:[%s3812_s2 + $0x298] sm:$0xff] }
  0x2c   :  { %v947_v19 = vmul.f32 %v931_v6, %v915_v62  ;;  %v295_v29 = vadd.f32 %v263_v4, %v197_v14  ;;  %v311_v30 = vadd.f32 %v279_v8, %v213_v15  ;;  %v475_v31 = vmul.f32 %v1898_v9, %v2488_v24  ;;  %v1994_v34 = vld [vmem:[%s3812_s2 + $0x790] sm:$0xff]  ;;  %v1851_v1 = vld [vmem:[%s3812_s2 + $0x318] sm:$0xff] }
  0x2d   :  { %v784_v36 = vadd.f32 %v752_v41, %v686_v20  ;;  %v557_v37 = vmul.f32 %v1914_v17, %v2490_v25  ;;  %v573_v38 = vmul.f32 %v1930_v18, %v2490_v25  ;;  %v2010_v39 = vld [vmem:[%s3812_s2 + $0x810] sm:$0xff]  ;;  %v800_v40 = vadd.f32 %v768_v46, %v702_v28  ;;  %v67_v41 = vld [vmem:[%s3812_s2 + $0x18] sm:$0xff] }
  0x2e   :  { %v963_v35 = vmax.f32 %v947_v19, 0.0  ;;  %v393_v42 = vadd.f32 %v361_v16, %v295_v29  ;;  %v409_v43 = vadd.f32 %v377_v21, %v311_v30  ;;  %v655_v44 = vmul.f32 %v1946_v27, %v2528_v47  ;;  %v2026_v45 = vld [vmem:[%s3812_s2 + $0x890] sm:$0xff]  ;;  %v1867_v7 = vld [vmem:[%s3812_s2 + $0x398] sm:$0xff] }
  0x2f   :  { %v882_v51 = vadd.f32 %v850_v54, %v784_v36  ;;  %v671_v46 = vmul.f32 %v1962_v32, %v2528_v47  ;;  %v753_v52 = vmul.f32 %v1978_v33, %v2531_v48  ;;  %v769_v53 = vmul.f32 %v1994_v34, %v2531_v48  ;;  %v1819_v54 = vld [vmem:[%s3812_s2 + $0x218] sm:$0xff] }
  0x30   :  { %2156 = vmatprep.mubr.msk.f32.mxu0 %vm981_vm0, %v963_v35  ;;  %v898_v58 = vadd.f32 %v866_v55, %v800_v40  ;;  %v491_v59 = vadd.f32 %v459_v26, %v393_v42  ;;  %v507_v60 = vadd.f32 %v475_v31, %v409_v43  ;;  %v851_v63 = vmul.f32 %v2010_v39, %v2534_v49  ;;  %v1883_v8 = vld [vmem:[%s3812_s2 + $0x418] sm:$0xff] }
  0x31   :  { %v916_v2 = vadd.f32 %v2459_v10, %v882_v51  ;;  %v867_v55 = vmul.f32 %v2026_v45, %v2534_v49  ;;  %v100_v3 = vmul.f32 %v2461_v11, %v67_v41  ;;  %v116_v4 = vmul.f32 %v2461_v11, %v83_v50  ;;  %v1899_v9 = vld [vmem:[%s3812_s2 + $0x498] sm:$0xff] }
  0x32   :  { %v932_v5 = vadd.f32 %v2459_v10, %v898_v58  ;;  %v589_v61 = vadd.f32 %v557_v37, %v491_v59  ;;  %v605_v62 = vadd.f32 %v573_v38, %v507_v60  ;;  %v166_v6 = vmul.f32 %v1787_v56, %v2463_v12  ;;  %v1915_v21 = vld [vmem:[%s3812_s2 + $0x518] sm:$0xff]  ;;  %v1788_v56 = vld [vmem:[%s3812_s2 + $0x120] sm:$0xff] }
  0x33   :  { %v182_v13 = vmul.f32 %v1803_v57, %v2463_v12  ;;  %v264_v14 = vmul.f32 %v1819_v54, %v2484_v22  ;;  %v280_v15 = vmul.f32 %v1835_v0, %v2484_v22  ;;  %v362_v16 = vmul.f32 %v1851_v1, %v2486_v23  ;;  %v1931_v26 = vld [vmem:[%s3812_s2 + $0x598] sm:$0xff]  ;;  %v1820_v54 = vld [vmem:[%s3812_s2 + $0x220] sm:$0xff] }
  0x34   :  { %v948_v17 = vmul.f32 %v932_v5, %v916_v2  ;;  %v687_v18 = vadd.f32 %v655_v44, %v589_v61  ;;  %v703_v19 = vadd.f32 %v671_v46, %v605_v62  ;;  %v198_v20 = vadd.f32 %v166_v6, %v100_v3  ;;  %v1947_v27 = vld [vmem:[%s3812_s2 + $0x618] sm:$0xff]  ;;  %v1836_v3 = vld [vmem:[%s3812_s2 + $0x2a0] sm:$0xff] }
  0x35   :  { %v214_v28 = vadd.f32 %v182_v13, %v116_v4  ;;  %v378_v29 = vmul.f32 %v1867_v7, %v2486_v23  ;;  %v460_v30 = vmul.f32 %v1883_v8, %v2488_v24  ;;  %v476_v31 = vmul.f32 %v1899_v9, %v2488_v24  ;;  %v1963_v32 = vld [vmem:[%s3812_s2 + $0x698] sm:$0xff]  ;;  %v1852_v4 = vld [vmem:[%s3812_s2 + $0x320] sm:$0xff] }
  0x36   :  { %v964_v33 = vmax.f32 %v948_v17, 0.0  ;;  %v785_v34 = vadd.f32 %v753_v52, %v687_v18  ;;  %v801_v35 = vadd.f32 %v769_v53, %v703_v19  ;;  %v296_v36 = vadd.f32 %v264_v14, %v198_v20  ;;  %v1979_v37 = vld [vmem:[%s3812_s2 + $0x718] sm:$0xff]  ;;  %v68_v52 = vld [vmem:[%s3812_s2 + $0x20] sm:$0xff] }
  0x37   :  { %v1995_v38 = vld [vmem:[%s3812_s2 + $0x798] sm:$0xff]  ;;  %v312_v40 = vadd.f32 %v280_v15, %v214_v28  ;;  %v558_v42 = vmul.f32 %v1915_v21, %v2490_v25  ;;  %v574_v43 = vmul.f32 %v1931_v26, %v2490_v25  ;;  %v656_v44 = vmul.f32 %v1947_v27, %v2528_v47  ;;  %v84_v53 = vld [vmem:[%s3812_s2 + $0xa0] sm:$0xff] }
  0x38   :  { %v2011_v39 = vld [vmem:[%s3812_s2 + $0x818] sm:$0xff]  ;;  %2157 = vmatmul.mubr.msk.f32.vlgmr.msra.gmra.mrb[0].mxu0 %vm981_vm0, %v964_v33  ;;  %v883_v41 = vadd.f32 %v851_v63, %v785_v34  ;;  %v899_v50 = vadd.f32 %v867_v55, %v801_v35  ;;  %v394_v51 = vadd.f32 %v362_v16, %v296_v36  ;;  %v672_v46 = vmul.f32 %v1963_v32, %v2528_v47  ;;  %v1804_v63 = vld [vmem:[%s3812_s2 + $0x1a0] sm:$0xff] }
  0x39   :  { %v2027_v45 = vld [vmem:[%s3812_s2 + $0x898] sm:$0xff]  ;;  %v410_v57 = vadd.f32 %v378_v29, %v312_v40  ;;  %v754_v58 = vmul.f32 %v1979_v37, %v2531_v48  ;;  %v770_v59 = vmul.f32 %v1995_v38, %v2531_v48  ;;  %v852_v60 = vmul.f32 %v2011_v39, %v2534_v49  ;;  %v1868_v7 = vld [vmem:[%s3812_s2 + $0x3a0] sm:$0xff] }
  0x3a   :  { %v917_v0 = vadd.f32 %v2459_v10, %v883_v41  ;;  %v933_v1 = vadd.f32 %v2459_v10, %v899_v50  ;;  %v492_v2 = vadd.f32 %v460_v30, %v394_v51  ;;  %v868_v55 = vmul.f32 %v2027_v45, %v2534_v49  ;;  %v1884_v15 = vld [vmem:[%s3812_s2 + $0x420] sm:$0xff] }
  0x3b   :  { %v508_v5 = vadd.f32 %v476_v31, %v410_v57  ;;  %v101_v61 = vmul.f32 %v2461_v11, %v68_v52  ;;  %v117_v62 = vmul.f32 %v2461_v11, %v84_v53  ;;  %v167_v6 = vmul.f32 %v1788_v56, %v2463_v12  ;;  %v1900_v16 = vld [vmem:[%s3812_s2 + $0x4a0] sm:$0xff]  ;;  %v69_v52 = vld [vmem:[%s3812_s2 + $0x28] sm:$0xff] }
  0x3c   :  { %v949_v8 = vmul.f32 %v933_v1, %v917_v0  ;;  %v590_v9 = vadd.f32 %v558_v42, %v492_v2  ;;  %v183_v13 = vmul.f32 %v1804_v63, %v2463_v12  ;;  %v265_v14 = vmul.f32 %v1820_v54, %v2484_v22  ;;  %v1916_v21 = vld [vmem:[%s3812_s2 + $0x520] sm:$0xff]  ;;  %v85_v53 = vld [vmem:[%s3812_s2 + $0xa8] sm:$0xff] }
  0x3d   :  { %v606_v17 = vadd.f32 %v574_v43, %v508_v5  ;;  %v199_v18 = vadd.f32 %v167_v6, %v101_v61  ;;  %v281_v19 = vmul.f32 %v1836_v3, %v2484_v22  ;;  %v363_v20 = vmul.f32 %v1852_v4, %v2486_v23  ;;  %v1932_v26 = vld [vmem:[%s3812_s2 + $0x5a0] sm:$0xff]  ;;  %v1805_v54 = vld [vmem:[%s3812_s2 + $0x1a8] sm:$0xff] }
  0x3e   :  { %v965_v27 = vmax.f32 %v949_v8, 0.0  ;;  %v688_v28 = vadd.f32 %v656_v44, %v590_v9  ;;  %v215_v29 = vadd.f32 %v183_v13, %v117_v62  ;;  %v379_v30 = vmul.f32 %v1868_v7, %v2486_v23  ;;  %v1948_v31 = vld [vmem:[%s3812_s2 + $0x620] sm:$0xff]  ;;  %v1837_v4 = vld [vmem:[%s3812_s2 + $0x2a8] sm:$0xff] }
  0x3f   :  { %v1964_v32 = vld [vmem:[%s3812_s2 + $0x6a0] sm:$0xff]  ;;  %v704_v33 = vadd.f32 %v672_v46, %v606_v17  ;;  %v297_v34 = vadd.f32 %v265_v14, %v199_v18  ;;  %v461_v35 = vmul.f32 %v1884_v15, %v2488_v24  ;;  %v477_v36 = vmul.f32 %v1900_v16, %v2488_v24  ;;  %v1853_v5 = vld [vmem:[%s3812_s2 + $0x328] sm:$0xff] }
  0x40   :  { %v1980_v37 = vld [vmem:[%s3812_s2 + $0x720] sm:$0xff]  ;;  %2159 = vmatprep.mubr.msk.f32.mxu0 %vm981_vm0, %v965_v27  ;;  %v786_v39 = vadd.f32 %v754_v58, %v688_v28  ;;  %v313_v40 = vadd.f32 %v281_v19, %v215_v29  ;;  %v559_v42 = vmul.f32 %v1916_v21, %v2490_v25  ;;  %v575_v43 = vmul.f32 %v1932_v26, %v2490_v25  ;;  %v1869_v14 = vld [vmem:[%s3812_s2 + $0x3a8] sm:$0xff] }
  0x41   :  { %v1996_v38 = vld [vmem:[%s3812_s2 + $0x7a0] sm:$0xff]  ;;  %v802_v41 = vadd.f32 %v770_v59, %v704_v33  ;;  %v395_v50 = vadd.f32 %v363_v20, %v297_v34  ;;  %v657_v51 = vmul.f32 %v1948_v31, %v2528_v47  ;;  %v673_v46 = vmul.f32 %v1964_v32, %v2528_v47  ;;  %v1789_v59 = vld [vmem:[%s3812_s2 + $0x128] sm:$0xff] }
  0x42   :  { %v2012_v44 = vld [vmem:[%s3812_s2 + $0x820] sm:$0xff]  ;;  %v884_v56 = vadd.f32 %v852_v60, %v786_v39  ;;  %v411_v57 = vadd.f32 %v379_v30, %v313_v40  ;;  %v755_v58 = vmul.f32 %v1980_v37, %v2531_v48  ;;  %v771_v63 = vmul.f32 %v1996_v38, %v2531_v48  ;;  %v1821_v60 = vld [vmem:[%s3812_s2 + $0x228] sm:$0xff] }
  0x43   :  { %v2028_v45 = vld [vmem:[%s3812_s2 + $0x8a0] sm:$0xff]  ;;  %v900_v0 = vadd.f32 %v868_v55, %v802_v41  ;;  %v493_v1 = vadd.f32 %v461_v35, %v395_v50  ;;  %v853_v2 = vmul.f32 %v2012_v44, %v2534_v49  ;;  %v102_v62 = vmul.f32 %v2461_v11, %v69_v52  ;;  %v1885_v15 = vld [vmem:[%s3812_s2 + $0x428] sm:$0xff] }
  0x44   :  { %v869_v3 = vmul.f32 %v2028_v45, %v2534_v49  ;;  %v918_v61 = vadd.f32 %v2459_v10, %v884_v56  ;;  %v509_v55 = vadd.f32 %v477_v36, %v411_v57  ;;  %v118_v6 = vmul.f32 %v2461_v11, %v85_v53  ;;  %v1901_v16 = vld [vmem:[%s3812_s2 + $0x4a8] sm:$0xff] }
  0x45   :  { %v934_v7 = vadd.f32 %v2459_v10, %v900_v0  ;;  %v591_v8 = vadd.f32 %v559_v42, %v493_v1  ;;  %v168_v9 = vmul.f32 %v1789_v59, %v2463_v12  ;;  %v184_v13 = vmul.f32 %v1805_v54, %v2463_v12  ;;  %v1917_v29 = vld [vmem:[%s3812_s2 + $0x528] sm:$0xff]  ;;  %v1790_v59 = vld [vmem:[%s3812_s2 + $0x130] sm:$0xff] }
  0x46   :  { %v607_v17 = vadd.f32 %v575_v43, %v509_v55  ;;  %v266_v18 = vmul.f32 %v1821_v60, %v2484_v22  ;;  %v282_v19 = vmul.f32 %v1837_v4, %v2484_v22  ;;  %v364_v20 = vmul.f32 %v1853_v5, %v2486_v23  ;;  %v1933_v30 = vld [vmem:[%s3812_s2 + $0x5a8] sm:$0xff]  ;;  %v1806_v60 = vld [vmem:[%s3812_s2 + $0x1b0] sm:$0xff] }
  0x47   :  { %v950_v21 = vmul.f32 %v934_v7, %v918_v61  ;;  %v689_v26 = vadd.f32 %v657_v51, %v591_v8  ;;  %v200_v27 = vadd.f32 %v168_v9, %v102_v62  ;;  %v216_v28 = vadd.f32 %v184_v13, %v118_v6  ;;  %v1949_v31 = vld [vmem:[%s3812_s2 + $0x628] sm:$0xff]  ;;  %v1822_v4 = vld [vmem:[%s3812_s2 + $0x230] sm:$0xff] }
  0x48   :  { %v705_v32 = vadd.f32 %v673_v46, %v607_v17  ;;  %v380_v33 = vmul.f32 %v1869_v14, %v2486_v23  ;;  %v462_v34 = vmul.f32 %v1885_v15, %v2488_v24  ;;  %v478_v35 = vmul.f32 %v1901_v16, %v2488_v24  ;;  %v1965_v36 = vld [vmem:[%s3812_s2 + $0x6a8] sm:$0xff]  ;;  %v1838_v62 = vld [vmem:[%s3812_s2 + $0x2b0] sm:$0xff] }
  0x49   :  { %v966_v37 = vmax.f32 %v950_v21, 0.0  ;;  %v787_v38 = vadd.f32 %v755_v58, %v689_v26  ;;  %v298_v39 = vadd.f32 %v266_v18, %v200_v27  ;;  %v314_v40 = vadd.f32 %v282_v19, %v216_v28  ;;  %v1981_v42 = vld [vmem:[%s3812_s2 + $0x728] sm:$0xff]  ;;  %v70_v58 = vld [vmem:[%s3812_s2 + $0x30] sm:$0xff] }
  0x4a   :  { %v1997_v43 = vld [vmem:[%s3812_s2 + $0x7a8] sm:$0xff]  ;;  %v803_v45 = vadd.f32 %v771_v63, %v705_v32  ;;  %v560_v41 = vmul.f32 %v1917_v29, %v2490_v25  ;;  %v576_v50 = vmul.f32 %v1933_v30, %v2490_v25  ;;  %v658_v51 = vmul.f32 %v1949_v31, %v2528_v47  ;;  %v86_v63 = vld [vmem:[%s3812_s2 + $0xb0] sm:$0xff] }
  0x4b   :  { %v2013_v44 = vld [vmem:[%s3812_s2 + $0x828] sm:$0xff]  ;;  %2160 = vmatmul.mubr.msk.f32.gmra.mrb[2].mxu0 %vm981_vm0, %v966_v37  ;;  %v885_v52 = vadd.f32 %v853_v2, %v787_v38  ;;  %v396_v53 = vadd.f32 %v364_v20, %v298_v39  ;;  %v412_v56 = vadd.f32 %v380_v33, %v314_v40  ;;  %v674_v57 = vmul.f32 %v1965_v36, %v2528_v47  ;;  %v1854_v6 = vld [vmem:[%s3812_s2 + $0x330] sm:$0xff] }
  0x4c   :  { %v2029_v46 = vld [vmem:[%s3812_s2 + $0x8a8] sm:$0xff]  ;;  %v901_v54 = vadd.f32 %v869_v3, %v803_v45  ;;  %v756_v0 = vmul.f32 %v1981_v42, %v2531_v48  ;;  %v772_v1 = vmul.f32 %v1997_v43, %v2531_v48  ;;  %v854_v2 = vmul.f32 %v2013_v44, %v2534_v49  ;;  %v1870_v14 = vld [vmem:[%s3812_s2 + $0x3b0] sm:$0xff] }
  0x4d   :  { %v919_v5 = vadd.f32 %v2459_v10, %v885_v52  ;;  %v494_v61 = vadd.f32 %v462_v34, %v396_v53  ;;  %v510_v55 = vadd.f32 %v478_v35, %v412_v56  ;;  %v870_v3 = vmul.f32 %v2029_v46, %v2534_v49  ;;  %v1886_v19 = vld [vmem:[%s3812_s2 + $0x430] sm:$0xff] }
  0x4e   :  { %v935_v7 = vadd.f32 %v2459_v10, %v901_v54  ;;  %v103_v8 = vmul.f32 %v2461_v11, %v70_v58  ;;  %v119_v9 = vmul.f32 %v2461_v11, %v86_v63  ;;  %v169_v13 = vmul.f32 %v1790_v59, %v2463_v12  ;;  %v1902_v20 = vld [vmem:[%s3812_s2 + $0x4b0] sm:$0xff]  ;;  %v71_v58 = vld [vmem:[%s3812_s2 + $0x38] sm:$0xff] }
  0x4f   :  { %v592_v15 = vadd.f32 %v560_v41, %v494_v61  ;;  %v608_v16 = vadd.f32 %v576_v50, %v510_v55  ;;  %v185_v17 = vmul.f32 %v1806_v60, %v2463_v12  ;;  %v267_v18 = vmul.f32 %v1822_v4, %v2484_v22  ;;  %v1918_v29 = vld [vmem:[%s3812_s2 + $0x530] sm:$0xff]  ;;  %v1791_v60 = vld [vmem:[%s3812_s2 + $0x138] sm:$0xff] }
  0x50   :  { %v951_v21 = vmul.f32 %v935_v7, %v919_v5  ;;  %v201_v26 = vadd.f32 %v169_v13, %v103_v8  ;;  %v283_v27 = vmul.f32 %v1838_v62, %v2484_v22  ;;  %v365_v28 = vmul.f32 %v1854_v6, %v2486_v23  ;;  %v1934_v34 = vld [vmem:[%s3812_s2 + $0x5b0] sm:$0xff]  ;;  %v1807_v4 = vld [vmem:[%s3812_s2 + $0x1b8] sm:$0xff] }
  0x51   :  { %v690_v30 = vadd.f32 %v658_v51, %v592_v15  ;;  %v706_v31 = vadd.f32 %v674_v57, %v608_v16  ;;  %v217_v32 = vadd.f32 %v185_v17, %v119_v9  ;;  %v381_v33 = vmul.f32 %v1870_v14, %v2486_v23  ;;  %v1950_v35 = vld [vmem:[%s3812_s2 + $0x630] sm:$0xff]  ;;  %v1839_v62 = vld [vmem:[%s3812_s2 + $0x2b8] sm:$0xff] }
  0x52   :  { %v1966_v36 = vld [vmem:[%s3812_s2 + $0x6b0] sm:$0xff]  ;;  %v967_v37 = vmax.f32 %v951_v21, 0.0  ;;  %v299_v38 = vadd.f32 %v267_v18, %v201_v26  ;;  %v463_v39 = vmul.f32 %v1886_v19, %v2488_v24  ;;  %v479_v40 = vmul.f32 %v1902_v20, %v2488_v24  ;;  %v1855_v13 = vld [vmem:[%s3812_s2 + $0x338] sm:$0xff] }
  0x53   :  { %v1982_v42 = vld [vmem:[%s3812_s2 + $0x730] sm:$0xff]  ;;  %v788_v43 = vadd.f32 %v756_v0, %v690_v30  ;;  %v804_v44 = vadd.f32 %v772_v1, %v706_v31  ;;  %v315_v45 = vadd.f32 %v283_v27, %v217_v32  ;;  %v561_v41 = vmul.f32 %v1918_v29, %v2490_v25  ;;  %v87_v1 = vld [vmem:[%s3812_s2 + $0xb8] sm:$0xff] }
  0x54   :  { %v1998_v50 = vld [vmem:[%s3812_s2 + $0x7b0] sm:$0xff]  ;;  %2162 = vmatprep.mubr.msk.f32.mxu0 %vm981_vm0, %v967_v37  ;;  %v397_v52 = vadd.f32 %v365_v28, %v299_v38  ;;  %v577_v53 = vmul.f32 %v1934_v34, %v2490_v25  ;;  %v659_v56 = vmul.f32 %v1950_v35, %v2528_v47  ;;  %v675_v57 = vmul.f32 %v1966_v36, %v2528_v47  ;;  %v1871_v18 = vld [vmem:[%s3812_s2 + $0x3b8] sm:$0xff] }
  0x55   :  { %v2014_v51 = vld [vmem:[%s3812_s2 + $0x830] sm:$0xff]  ;;  %v886_v63 = vadd.f32 %v854_v2, %v788_v43  ;;  %v902_v59 = vadd.f32 %v870_v3, %v804_v44  ;;  %v413_v54 = vadd.f32 %v381_v33, %v315_v45  ;;  %v757_v0 = vmul.f32 %v1982_v42, %v2531_v48  ;;  %v1823_v3 = vld [vmem:[%s3812_s2 + $0x238] sm:$0xff] }
  0x56   :  { %v2030_v46 = vld [vmem:[%s3812_s2 + $0x8b0] sm:$0xff]  ;;  %v495_v5 = vadd.f32 %v463_v39, %v397_v52  ;;  %v773_v61 = vmul.f32 %v1998_v50, %v2531_v48  ;;  %v855_v2 = vmul.f32 %v2014_v51, %v2534_v49  ;;  %v104_v9 = vmul.f32 %v2461_v11, %v71_v58  ;;  %v1887_v19 = vld [vmem:[%s3812_s2 + $0x438] sm:$0xff] }
  0x57   :  { %v871_v55 = vmul.f32 %v2030_v46, %v2534_v49  ;;  %v920_v6 = vadd.f32 %v2459_v10, %v886_v63  ;;  %v936_v7 = vadd.f32 %v2459_v10, %v902_v59  ;;  %v511_v8 = vadd.f32 %v479_v40, %v413_v54  ;;  %v1903_v28 = vld [vmem:[%s3812_s2 + $0x4b8] sm:$0xff] }
  0x58   :  { %v593_v14 = vadd.f32 %v561_v41, %v495_v5  ;;  %v120_v15 = vmul.f32 %v2461_v11, %v87_v1  ;;  %v170_v16 = vmul.f32 %v1791_v60, %v2463_v12  ;;  %v186_v17 = vmul.f32 %v1807_v4, %v2463_v12  ;;  %v1919_v33 = vld [vmem:[%s3812_s2 + $0x538] sm:$0xff]  ;;  %v88_v1 = vld [vmem:[%s3812_s2 + $0xc0] sm:$0xff] }
  0x59   :  { %v952_v20 = vmul.f32 %v936_v7, %v920_v6  ;;  %v609_v21 = vadd.f32 %v577_v53, %v511_v8  ;;  %v268_v26 = vmul.f32 %v1823_v3, %v2484_v22  ;;  %v284_v27 = vmul.f32 %v1839_v62, %v2484_v22  ;;  %v1935_v34 = vld [vmem:[%s3812_s2 + $0x5b8] sm:$0xff]  ;;  %v1792_v60 = vld [vmem:[%s3812_s2 + $0x140] sm:$0xff] }
  0x5a   :  { %v691_v29 = vadd.f32 %v659_v56, %v593_v14  ;;  %v202_v30 = vadd.f32 %v170_v16, %v104_v9  ;;  %v218_v31 = vadd.f32 %v186_v17, %v120_v15  ;;  %v366_v32 = vmul.f32 %v1855_v13, %v2486_v23  ;;  %v1951_v35 = vld [vmem:[%s3812_s2 + $0x638] sm:$0xff]  ;;  %v1808_v3 = vld [vmem:[%s3812_s2 + $0x1c0] sm:$0xff] }
  0x5b   :  { %v968_v36 = vmax.f32 %v952_v20, 0.0  ;;  %v707_v37 = vadd.f32 %v675_v57, %v609_v21  ;;  %v382_v38 = vmul.f32 %v1871_v18, %v2486_v23  ;;  %v464_v39 = vmul.f32 %v1887_v19, %v2488_v24  ;;  %v1967_v40 = vld [vmem:[%s3812_s2 + $0x6b8] sm:$0xff]  ;;  %v1824_v62 = vld [vmem:[%s3812_s2 + $0x240] sm:$0xff] }
  0x5c   :  { %v789_v42 = vadd.f32 %v757_v0, %v691_v29  ;;  %v300_v43 = vadd.f32 %v268_v26, %v202_v30  ;;  %v316_v44 = vadd.f32 %v284_v27, %v218_v31  ;;  %v480_v45 = vmul.f32 %v1903_v28, %v2488_v24  ;;  %v1983_v41 = vld [vmem:[%s3812_s2 + $0x738] sm:$0xff]  ;;  %v72_v0 = vld [vmem:[%s3812_s2 + $0x40] sm:$0xff] }
  0x5d   :  { %v1999_v50 = vld [vmem:[%s3812_s2 + $0x7b8] sm:$0xff]  ;;  %2163 = vmatmul.mubr.msk.f32.gmra.mrb[4].mxu0 %vm981_vm0, %v968_v36  ;;  %v805_v46 = vadd.f32 %v773_v61, %v707_v37  ;;  %v562_v52 = vmul.f32 %v1919_v33, %v2490_v25  ;;  %v578_v53 = vmul.f32 %v1935_v34, %v2490_v25  ;;  %v660_v56 = vmul.f32 %v1951_v35, %v2528_v47  ;;  %v1840_v9 = vld [vmem:[%s3812_s2 + $0x2c0] sm:$0xff] }
  0x5e   :  { %v2015_v51 = vld [vmem:[%s3812_s2 + $0x838] sm:$0xff]  ;;  %v887_v58 = vadd.f32 %v855_v2, %v789_v42  ;;  %v398_v63 = vadd.f32 %v366_v32, %v300_v43  ;;  %v414_v59 = vadd.f32 %v382_v38, %v316_v44  ;;  %v676_v54 = vmul.f32 %v1967_v40, %v2528_v47  ;;  %v1856_v13 = vld [vmem:[%s3812_s2 + $0x340] sm:$0xff] }
  0x5f   :  { %v2031_v57 = vld [vmem:[%s3812_s2 + $0x8b8] sm:$0xff]  ;;  %v903_v4 = vadd.f32 %v871_v55, %v805_v46  ;;  %v758_v5 = vmul.f32 %v1983_v41, %v2531_v48  ;;  %v774_v61 = vmul.f32 %v1999_v50, %v2531_v48  ;;  %v856_v2 = vmul.f32 %v2015_v51, %v2534_v49  ;;  %v1872_v18 = vld [vmem:[%s3812_s2 + $0x3c0] sm:$0xff] }
  0x60   :  { %v921_v6 = vadd.f32 %v2459_v10, %v887_v58  ;;  %v496_v7 = vadd.f32 %v464_v39, %v398_v63  ;;  %v512_v8 = vadd.f32 %v480_v45, %v414_v59  ;;  %v872_v55 = vmul.f32 %v2031_v57, %v2534_v49  ;;  %v1888_v27 = vld [vmem:[%s3812_s2 + $0x440] sm:$0xff] }
  0x61   :  { %v937_v14 = vadd.f32 %v2459_v10, %v903_v4  ;;  %v105_v15 = vmul.f32 %v2461_v11, %v72_v0  ;;  %v121_v16 = vmul.f32 %v2461_v11, %v88_v1  ;;  %v171_v17 = vmul.f32 %v1792_v60, %v2463_v12  ;;  %v1904_v28 = vld [vmem:[%s3812_s2 + $0x4c0] sm:$0xff]  ;;  %v73_v0 = vld [vmem:[%s3812_s2 + $0x48] sm:$0xff] }
  0x62   :  { %v594_v19 = vadd.f32 %v562_v52, %v496_v7  ;;  %v610_v20 = vadd.f32 %v578_v53, %v512_v8  ;;  %v187_v21 = vmul.f32 %v1808_v3, %v2463_v12  ;;  %v269_v26 = vmul.f32 %v1824_v62, %v2484_v22  ;;  %v1920_v33 = vld [vmem:[%s3812_s2 + $0x540] sm:$0xff]  ;;  %v1793_v3 = vld [vmem:[%s3812_s2 + $0x148] sm:$0xff] }
  0x63   :  { %v953_v29 = vmul.f32 %v937_v14, %v921_v6  ;;  %v203_v30 = vadd.f32 %v171_v17, %v105_v15  ;;  %v285_v31 = vmul.f32 %v1840_v9, %v2484_v22  ;;  %v367_v32 = vmul.f32 %v1856_v13, %v2486_v23  ;;  %v1936_v38 = vld [vmem:[%s3812_s2 + $0x5c0] sm:$0xff]  ;;  %v1809_v62 = vld [vmem:[%s3812_s2 + $0x1c8] sm:$0xff] }
  0x64   :  { %v692_v34 = vadd.f32 %v660_v56, %v594_v19  ;;  %v708_v35 = vadd.f32 %v676_v54, %v610_v20  ;;  %v219_v36 = vadd.f32 %v187_v21, %v121_v16  ;;  %v383_v37 = vmul.f32 %v1872_v18, %v2486_v23  ;;  %v1952_v39 = vld [vmem:[%s3812_s2 + $0x640] sm:$0xff]  ;;  %v1841_v9 = vld [vmem:[%s3812_s2 + $0x2c8] sm:$0xff] }
  0x65   :  { %v1968_v40 = vld [vmem:[%s3812_s2 + $0x6c0] sm:$0xff]  ;;  %v969_v42 = vmax.f32 %v953_v29, 0.0  ;;  %v301_v43 = vadd.f32 %v269_v26, %v203_v30  ;;  %v465_v44 = vmul.f32 %v1888_v27, %v2488_v24  ;;  %v481_v45 = vmul.f32 %v1904_v28, %v2488_v24  ;;  %v1857_v17 = vld [vmem:[%s3812_s2 + $0x348] sm:$0xff] }
  0x66   :  { %v1984_v41 = vld [vmem:[%s3812_s2 + $0x740] sm:$0xff]  ;;  %v790_v50 = vadd.f32 %v758_v5, %v692_v34  ;;  %v806_v51 = vadd.f32 %v774_v61, %v708_v35  ;;  %v317_v46 = vadd.f32 %v285_v31, %v219_v36  ;;  %v563_v52 = vmul.f32 %v1920_v33, %v2490_v25  ;;  %v89_v61 = vld [vmem:[%s3812_s2 + $0xc8] sm:$0xff] }
  0x67   :  { %v2000_v53 = vld [vmem:[%s3812_s2 + $0x7c0] sm:$0xff]  ;;  %2165 = vmatprep.mubr.msk.f32.mxu0 %vm981_vm0, %v969_v42  ;;  %v399_v58 = vadd.f32 %v367_v32, %v301_v43  ;;  %v579_v63 = vmul.f32 %v1936_v38, %v2490_v25  ;;  %v661_v59 = vmul.f32 %v1952_v39, %v2528_v47  ;;  %v677_v54 = vmul.f32 %v1968_v40, %v2528_v47  ;;  %v1873_v26 = vld [vmem:[%s3812_s2 + $0x3c8] sm:$0xff] }
  0x68   :  { %v2016_v56 = vld [vmem:[%s3812_s2 + $0x840] sm:$0xff]  ;;  %v888_v1 = vadd.f32 %v856_v2, %v790_v50  ;;  %v904_v60 = vadd.f32 %v872_v55, %v806_v51  ;;  %v415_v4 = vadd.f32 %v383_v37, %v317_v46  ;;  %v759_v5 = vmul.f32 %v1984_v41, %v2531_v48  ;;  %v1825_v55 = vld [vmem:[%s3812_s2 + $0x248] sm:$0xff] }
  0x69   :  { %v2032_v57 = vld [vmem:[%s3812_s2 + $0x8c0] sm:$0xff]  ;;  %v497_v6 = vadd.f32 %v465_v44, %v399_v58  ;;  %v775_v7 = vmul.f32 %v2000_v53, %v2531_v48  ;;  %v857_v2 = vmul.f32 %v2016_v56, %v2534_v49  ;;  %v106_v16 = vmul.f32 %v2461_v11, %v73_v0  ;;  %v1889_v27 = vld [vmem:[%s3812_s2 + $0x448] sm:$0xff] }
  0x6a   :  { %v873_v8 = vmul.f32 %v2032_v57, %v2534_v49  ;;  %v922_v13 = vadd.f32 %v2459_v10, %v888_v1  ;;  %v938_v14 = vadd.f32 %v2459_v10, %v904_v60  ;;  %v513_v15 = vadd.f32 %v481_v45, %v415_v4  ;;  %v1905_v32 = vld [vmem:[%s3812_s2 + $0x4c8] sm:$0xff] }
  0x6b   :  { %v595_v18 = vadd.f32 %v563_v52, %v497_v6  ;;  %v122_v19 = vmul.f32 %v2461_v11, %v89_v61  ;;  %v172_v20 = vmul.f32 %v1793_v3, %v2463_v12  ;;  %v188_v21 = vmul.f32 %v1809_v62, %v2463_v12  ;;  %v1921_v37 = vld [vmem:[%s3812_s2 + $0x548] sm:$0xff]  ;;  %v90_v61 = vld [vmem:[%s3812_s2 + $0xd0] sm:$0xff] }
  0x6c   :  { %v954_v28 = vmul.f32 %v938_v14, %v922_v13  ;;  %v611_v29 = vadd.f32 %v579_v63, %v513_v15  ;;  %v270_v30 = vmul.f32 %v1825_v55, %v2484_v22  ;;  %v286_v31 = vmul.f32 %v1841_v9, %v2484_v22  ;;  %v1937_v38 = vld [vmem:[%s3812_s2 + $0x5c8] sm:$0xff]  ;;  %v1794_v3 = vld [vmem:[%s3812_s2 + $0x150] sm:$0xff] }
  0x6d   :  { %v693_v33 = vadd.f32 %v661_v59, %v595_v18  ;;  %v204_v34 = vadd.f32 %v172_v20, %v106_v16  ;;  %v220_v35 = vadd.f32 %v188_v21, %v122_v19  ;;  %v368_v36 = vmul.f32 %v1857_v17, %v2486_v23  ;;  %v1953_v39 = vld [vmem:[%s3812_s2 + $0x648] sm:$0xff]  ;;  %v1810_v55 = vld [vmem:[%s3812_s2 + $0x1d0] sm:$0xff] }
  0x6e   :  { %v970_v40 = vmax.f32 %v954_v28, 0.0  ;;  %v709_v42 = vadd.f32 %v677_v54, %v611_v29  ;;  %v384_v43 = vmul.f32 %v1873_v26, %v2486_v23  ;;  %v466_v44 = vmul.f32 %v1889_v27, %v2488_v24  ;;  %v1969_v45 = vld [vmem:[%s3812_s2 + $0x6c8] sm:$0xff]  ;;  %v1826_v9 = vld [vmem:[%s3812_s2 + $0x250] sm:$0xff] }
  0x6f   :  { %v791_v41 = vadd.f32 %v759_v5, %v693_v33  ;;  %v302_v50 = vadd.f32 %v270_v30, %v204_v34  ;;  %v318_v51 = vadd.f32 %v286_v31, %v220_v35  ;;  %v482_v46 = vmul.f32 %v1905_v32, %v2488_v24  ;;  %v1985_v52 = vld [vmem:[%s3812_s2 + $0x748] sm:$0xff]  ;;  %v74_v5 = vld [vmem:[%s3812_s2 + $0x50] sm:$0xff] }
  0x70   :  { %v2001_v53 = vld [vmem:[%s3812_s2 + $0x7c8] sm:$0xff]  ;;  %2166 = vmatmul.mubr.msk.f32.gmra.mrb[6].mxu0 %vm981_vm0, %v970_v40  ;;  %v807_v57 = vadd.f32 %v775_v7, %v709_v42  ;;  %v564_v58 = vmul.f32 %v1921_v37, %v2490_v25  ;;  %v580_v63 = vmul.f32 %v1937_v38, %v2490_v25  ;;  %v662_v59 = vmul.f32 %v1953_v39, %v2528_v47  ;;  %v1842_v16 = vld [vmem:[%s3812_s2 + $0x2d0] sm:$0xff] }
  0x71   :  { %v2017_v56 = vld [vmem:[%s3812_s2 + $0x848] sm:$0xff]  ;;  %v889_v0 = vadd.f32 %v857_v2, %v791_v41  ;;  %v400_v1 = vadd.f32 %v368_v36, %v302_v50  ;;  %v416_v60 = vadd.f32 %v384_v43, %v318_v51  ;;  %v678_v4 = vmul.f32 %v1969_v45, %v2528_v47  ;;  %v1858_v17 = vld [vmem:[%s3812_s2 + $0x350] sm:$0xff] }
  0x72   :  { %v2033_v54 = vld [vmem:[%s3812_s2 + $0x8c8] sm:$0xff]  ;;  %v905_v62 = vadd.f32 %v873_v8, %v807_v57  ;;  %v760_v6 = vmul.f32 %v1985_v52, %v2531_v48  ;;  %v776_v7 = vmul.f32 %v2001_v53, %v2531_v48  ;;  %v858_v2 = vmul.f32 %v2017_v56, %v2534_v49  ;;  %v1874_v26 = vld [vmem:[%s3812_s2 + $0x3d0] sm:$0xff] }
  0x73   :  { %v923_v13 = vadd.f32 %v2459_v10, %v889_v0  ;;  %v498_v14 = vadd.f32 %v466_v44, %v400_v1  ;;  %v514_v15 = vadd.f32 %v482_v46, %v416_v60  ;;  %v874_v8 = vmul.f32 %v2033_v54, %v2534_v49  ;;  %v1890_v31 = vld [vmem:[%s3812_s2 + $0x450] sm:$0xff] }
  0x74   :  { %v939_v18 = vadd.f32 %v2459_v10, %v905_v62  ;;  %v107_v19 = vmul.f32 %v2461_v11, %v74_v5  ;;  %v123_v20 = vmul.f32 %v2461_v11, %v90_v61  ;;  %v173_v21 = vmul.f32 %v1794_v3, %v2463_v12  ;;  %v1906_v32 = vld [vmem:[%s3812_s2 + $0x4d0] sm:$0xff]  ;;  %v75_v5 = vld [vmem:[%s3812_s2 + $0x58] sm:$0xff] }
  0x75   :  { %v596_v27 = vadd.f32 %v564_v58, %v498_v14  ;;  %v612_v28 = vadd.f32 %v580_v63, %v514_v15  ;;  %v189_v29 = vmul.f32 %v1810_v55, %v2463_v12  ;;  %v271_v30 = vmul.f32 %v1826_v9, %v2484_v22  ;;  %v1922_v37 = vld [vmem:[%s3812_s2 + $0x550] sm:$0xff]  ;;  %v1795_v55 = vld [vmem:[%s3812_s2 + $0x158] sm:$0xff] }
  0x76   :  { %v955_v33 = vmul.f32 %v939_v18, %v923_v13  ;;  %v205_v34 = vadd.f32 %v173_v21, %v107_v19  ;;  %v287_v35 = vmul.f32 %v1842_v16, %v2484_v22  ;;  %v369_v36 = vmul.f32 %v1858_v17, %v2486_v23  ;;  %v1938_v43 = vld [vmem:[%s3812_s2 + $0x5d0] sm:$0xff]  ;;  %v1811_v9 = vld [vmem:[%s3812_s2 + $0x1d8] sm:$0xff] }
  0x77   :  { %v694_v38 = vadd.f32 %v662_v59, %v596_v27  ;;  %v710_v39 = vadd.f32 %v678_v4, %v612_v28  ;;  %v221_v40 = vadd.f32 %v189_v29, %v123_v20  ;;  %v385_v42 = vmul.f32 %v1874_v26, %v2486_v23  ;;  %v1954_v44 = vld [vmem:[%s3812_s2 + $0x650] sm:$0xff]  ;;  %v1843_v16 = vld [vmem:[%s3812_s2 + $0x2d8] sm:$0xff] }
  0x78   :  { %v1970_v45 = vld [vmem:[%s3812_s2 + $0x6d0] sm:$0xff]  ;;  %v971_v41 = vmax.f32 %v955_v33, 0.0  ;;  %v303_v50 = vadd.f32 %v271_v30, %v205_v34  ;;  %v467_v51 = vmul.f32 %v1890_v31, %v2488_v24  ;;  %v483_v46 = vmul.f32 %v1906_v32, %v2488_v24  ;;  %v1859_v21 = vld [vmem:[%s3812_s2 + $0x358] sm:$0xff] }
  0x79   :  { %v1986_v52 = vld [vmem:[%s3812_s2 + $0x750] sm:$0xff]  ;;  %v792_v53 = vadd.f32 %v760_v6, %v694_v38  ;;  %v808_v56 = vadd.f32 %v776_v7, %v710_v39  ;;  %v319_v57 = vadd.f32 %v287_v35, %v221_v40  ;;  %v565_v58 = vmul.f32 %v1922_v37, %v2490_v25  ;;  %v91_v7 = vld [vmem:[%s3812_s2 + $0xd8] sm:$0xff] }
  0x7a   :  { %v2002_v63 = vld [vmem:[%s3812_s2 + $0x7d0] sm:$0xff]  ;;  %2168 = vmatprep.mubr.msk.f32.mxu0 %vm981_vm0, %v971_v41  ;;  %v401_v0 = vadd.f32 %v369_v36, %v303_v50  ;;  %v581_v1 = vmul.f32 %v1938_v43, %v2490_v25  ;;  %v663_v60 = vmul.f32 %v1954_v44, %v2528_v47  ;;  %v679_v4 = vmul.f32 %v1970_v45, %v2528_v47  ;;  %v1875_v30 = vld [vmem:[%s3812_s2 + $0x3d8] sm:$0xff] }
  0x7b   :  { %v2018_v59 = vld [vmem:[%s3812_s2 + $0x850] sm:$0xff]  ;;  %v890_v61 = vadd.f32 %v858_v2, %v792_v53  ;;  %v906_v3 = vadd.f32 %v874_v8, %v808_v56  ;;  %v417_v62 = vadd.f32 %v385_v42, %v319_v57  ;;  %v761_v6 = vmul.f32 %v1986_v52, %v2531_v48  ;;  %v1827_v8 = vld [vmem:[%s3812_s2 + $0x258] sm:$0xff] }
  0x7c   :  { %v2034_v54 = vld [vmem:[%s3812_s2 + $0x8d0] sm:$0xff]  ;;  %v499_v13 = vadd.f32 %v467_v51, %v401_v0  ;;  %v777_v14 = vmul.f32 %v2002_v63, %v2531_v48  ;;  %v859_v2 = vmul.f32 %v2018_v59, %v2534_v49  ;;  %v108_v20 = vmul.f32 %v2461_v11, %v75_v5  ;;  %v1891_v31 = vld [vmem:[%s3812_s2 + $0x458] sm:$0xff] }
  0x7d   :  { %v875_v15 = vmul.f32 %v2034_v54, %v2534_v49  ;;  %v924_v17 = vadd.f32 %v2459_v10, %v890_v61  ;;  %v940_v18 = vadd.f32 %v2459_v10, %v906_v3  ;;  %v515_v19 = vadd.f32 %v483_v46, %v417_v62  ;;  %v1907_v36 = vld [vmem:[%s3812_s2 + $0x4d8] sm:$0xff] }
  0x7e   :  { %v597_v26 = vadd.f32 %v565_v58, %v499_v13  ;;  %v124_v27 = vmul.f32 %v2461_v11, %v91_v7  ;;  %v174_v28 = vmul.f32 %v1795_v55, %v2463_v12  ;;  %v190_v29 = vmul.f32 %v1811_v9, %v2463_v12  ;;  %v1923_v42 = vld [vmem:[%s3812_s2 + $0x558] sm:$0xff]  ;;  %v92_v7 = vld [vmem:[%s3812_s2 + $0xe0] sm:$0xff] }
  0x7f   :  { %v956_v32 = vmul.f32 %v940_v18, %v924_v17  ;;  %v613_v33 = vadd.f32 %v581_v1, %v515_v19  ;;  %v272_v34 = vmul.f32 %v1827_v8, %v2484_v22  ;;  %v288_v35 = vmul.f32 %v1843_v16, %v2484_v22  ;;  %v1939_v43 = vld [vmem:[%s3812_s2 + $0x5d8] sm:$0xff]  ;;  %v1796_v55 = vld [vmem:[%s3812_s2 + $0x160] sm:$0xff] }
  0x80   :  { %v695_v37 = vadd.f32 %v663_v60, %v597_v26  ;;  %v206_v38 = vadd.f32 %v174_v28, %v108_v20  ;;  %v222_v39 = vadd.f32 %v190_v29, %v124_v27  ;;  %v370_v40 = vmul.f32 %v1859_v21, %v2486_v23  ;;  %v1955_v44 = vld [vmem:[%s3812_s2 + $0x658] sm:$0xff]  ;;  %v1812_v8 = vld [vmem:[%s3812_s2 + $0x1e0] sm:$0xff] }
  0x81   :  { %v972_v45 = vmax.f32 %v956_v32, 0.0  ;;  %v711_v41 = vadd.f32 %v679_v4, %v613_v33  ;;  %v386_v50 = vmul.f32 %v1875_v30, %v2486_v23  ;;  %v468_v51 = vmul.f32 %v1891_v31, %v2488_v24  ;;  %v1971_v46 = vld [vmem:[%s3812_s2 + $0x6d8] sm:$0xff]  ;;  %v1828_v16 = vld [vmem:[%s3812_s2 + $0x260] sm:$0xff] }
  0x82   :  { %v793_v52 = vadd.f32 %v761_v6, %v695_v37  ;;  %v304_v53 = vadd.f32 %v272_v34, %v206_v38  ;;  %v320_v56 = vadd.f32 %v288_v35, %v222_v39  ;;  %v484_v57 = vmul.f32 %v1907_v36, %v2488_v24  ;;  %v1987_v58 = vld [vmem:[%s3812_s2 + $0x758] sm:$0xff]  ;;  %v76_v6 = vld [vmem:[%s3812_s2 + $0x60] sm:$0xff] }
  0x83   :  { %v2003_v63 = vld [vmem:[%s3812_s2 + $0x7d8] sm:$0xff]  ;;  %2169 = vmatmul.mubr.msk.f32.gmra.mrb[8].mxu0 %vm981_vm0, %v972_v45  ;;  %v809_v54 = vadd.f32 %v777_v14, %v711_v41  ;;  %v566_v0 = vmul.f32 %v1923_v42, %v2490_v25  ;;  %v582_v1 = vmul.f32 %v1939_v43, %v2490_v25  ;;  %v664_v60 = vmul.f32 %v1955_v44, %v2528_v47  ;;  %v1844_v20 = vld [vmem:[%s3812_s2 + $0x2e0] sm:$0xff] }
  0x84   :  { %v2019_v59 = vld [vmem:[%s3812_s2 + $0x858] sm:$0xff]  ;;  %v891_v5 = vadd.f32 %v859_v2, %v793_v52  ;;  %v402_v61 = vadd.f32 %v370_v40, %v304_v53  ;;  %v418_v3 = vadd.f32 %v386_v50, %v320_v56  ;;  %v680_v62 = vmul.f32 %v1971_v46, %v2528_v47  ;;  %v1860_v21 = vld [vmem:[%s3812_s2 + $0x360] sm:$0xff] }
  0x85   :  { %v2035_v4 = vld [vmem:[%s3812_s2 + $0x8d8] sm:$0xff]  ;;  %v907_v9 = vadd.f32 %v875_v15, %v809_v54  ;;  %v762_v13 = vmul.f32 %v1987_v58, %v2531_v48  ;;  %v778_v14 = vmul.f32 %v2003_v63, %v2531_v48  ;;  %v860_v2 = vmul.f32 %v2019_v59, %v2534_v49  ;;  %v1876_v30 = vld [vmem:[%s3812_s2 + $0x3e0] sm:$0xff] }
  0x86   :  { %v925_v17 = vadd.f32 %v2459_v10, %v891_v5  ;;  %v500_v18 = vadd.f32 %v468_v51, %v402_v61  ;;  %v516_v19 = vadd.f32 %v484_v57, %v418_v3  ;;  %v876_v15 = vmul.f32 %v2035_v4, %v2534_v49  ;;  %v1892_v35 = vld [vmem:[%s3812_s2 + $0x460] sm:$0xff] }
  0x87   :  { %v941_v26 = vadd.f32 %v2459_v10, %v907_v9  ;;  %v109_v27 = vmul.f32 %v2461_v11, %v76_v6  ;;  %v125_v28 = vmul.f32 %v2461_v11, %v92_v7  ;;  %v175_v29 = vmul.f32 %v1796_v55, %v2463_v12  ;;  %v1908_v36 = vld [vmem:[%s3812_s2 + $0x4e0] sm:$0xff]  ;;  %v77_v6 = vld [vmem:[%s3812_s2 + $0x68] sm:$0xff] }
  0x88   :  { %v598_v31 = vadd.f32 %v566_v0, %v500_v18  ;;  %v614_v32 = vadd.f32 %v582_v1, %v516_v19  ;;  %v191_v33 = vmul.f32 %v1812_v8, %v2463_v12  ;;  %v273_v34 = vmul.f32 %v1828_v16, %v2484_v22  ;;  %v1924_v42 = vld [vmem:[%s3812_s2 + $0x560] sm:$0xff]  ;;  %v1797_v8 = vld [vmem:[%s3812_s2 + $0x168] sm:$0xff] }
  0x89   :  { %v957_v37 = vmul.f32 %v941_v26, %v925_v17  ;;  %v207_v38 = vadd.f32 %v175_v29, %v109_v27  ;;  %v289_v39 = vmul.f32 %v1844_v20, %v2484_v22  ;;  %v371_v40 = vmul.f32 %v1860_v21, %v2486_v23  ;;  %v1940_v50 = vld [vmem:[%s3812_s2 + $0x5e0] sm:$0xff]  ;;  %v1813_v16 = vld [vmem:[%s3812_s2 + $0x1e8] sm:$0xff] }
  0x8a   :  { %v696_v43 = vadd.f32 %v664_v60, %v598_v31  ;;  %v712_v44 = vadd.f32 %v680_v62, %v614_v32  ;;  %v223_v45 = vadd.f32 %v191_v33, %v125_v28  ;;  %v387_v41 = vmul.f32 %v1876_v30, %v2486_v23  ;;  %v1956_v51 = vld [vmem:[%s3812_s2 + $0x660] sm:$0xff]  ;;  %v1845_v20 = vld [vmem:[%s3812_s2 + $0x2e8] sm:$0xff] }
  0x8b   :  { %v1972_v46 = vld [vmem:[%s3812_s2 + $0x6e0] sm:$0xff]  ;;  %v973_v52 = vmax.f32 %v957_v37, 0.0  ;;  %v305_v53 = vadd.f32 %v273_v34, %v207_v38  ;;  %v469_v56 = vmul.f32 %v1892_v35, %v2488_v24  ;;  %v485_v57 = vmul.f32 %v1908_v36, %v2488_v24  ;;  %v1861_v29 = vld [vmem:[%s3812_s2 + $0x368] sm:$0xff] }
  0x8c   :  { %v1988_v58 = vld [vmem:[%s3812_s2 + $0x760] sm:$0xff]  ;;  %v794_v63 = vadd.f32 %v762_v13, %v696_v43  ;;  %v810_v59 = vadd.f32 %v778_v14, %v712_v44  ;;  %v321_v54 = vadd.f32 %v289_v39, %v223_v45  ;;  %v567_v0 = vmul.f32 %v1924_v42, %v2490_v25  ;;  %v93_v14 = vld [vmem:[%s3812_s2 + $0xe8] sm:$0xff] }
  0x8d   :  { %v2004_v1 = vld [vmem:[%s3812_s2 + $0x7e0] sm:$0xff]  ;;  %2171 = vmatprep.mubr.msk.f32.mxu0 %vm981_vm0, %v973_v52  ;;  %v403_v5 = vadd.f32 %v371_v40, %v305_v53  ;;  %v583_v61 = vmul.f32 %v1940_v50, %v2490_v25  ;;  %v665_v3 = vmul.f32 %v1956_v51, %v2528_v47  ;;  %v681_v62 = vmul.f32 %v1972_v46, %v2528_v47  ;;  %v1877_v34 = vld [vmem:[%s3812_s2 + $0x3e8] sm:$0xff] }
  0x8e   :  { %v2020_v60 = vld [vmem:[%s3812_s2 + $0x860] sm:$0xff]  ;;  %v892_v7 = vadd.f32 %v860_v2, %v794_v63  ;;  %v908_v55 = vadd.f32 %v876_v15, %v810_v59  ;;  %v419_v9 = vadd.f32 %v387_v41, %v321_v54  ;;  %v763_v13 = vmul.f32 %v1988_v58, %v2531_v48  ;;  %v1829_v15 = vld [vmem:[%s3812_s2 + $0x268] sm:$0xff] }
  0x8f   :  { %v2036_v4 = vld [vmem:[%s3812_s2 + $0x8e0] sm:$0xff]  ;;  %v501_v17 = vadd.f32 %v469_v56, %v403_v5  ;;  %v779_v18 = vmul.f32 %v2004_v1, %v2531_v48  ;;  %v861_v2 = vmul.f32 %v2020_v60, %v2534_v49  ;;  %v110_v28 = vmul.f32 %v2461_v11, %v77_v6  ;;  %v1893_v35 = vld [vmem:[%s3812_s2 + $0x468] sm:$0xff] }
  0x90   :  { %v877_v19 = vmul.f32 %v2036_v4, %v2534_v49  ;;  %v926_v21 = vadd.f32 %v2459_v10, %v892_v7  ;;  %v942_v26 = vadd.f32 %v2459_v10, %v908_v55  ;;  %v517_v27 = vadd.f32 %v485_v57, %v419_v9  ;;  %v1909_v40 = vld [vmem:[%s3812_s2 + $0x4e8] sm:$0xff] }
  0x91   :  { %v599_v30 = vadd.f32 %v567_v0, %v501_v17  ;;  %v126_v31 = vmul.f32 %v2461_v11, %v93_v14  ;;  %v176_v32 = vmul.f32 %v1797_v8, %v2463_v12  ;;  %v192_v33 = vmul.f32 %v1813_v16, %v2463_v12  ;;  %v1925_v41 = vld [vmem:[%s3812_s2 + $0x568] sm:$0xff]  ;;  %v94_v14 = vld [vmem:[%s3812_s2 + $0xf0] sm:$0xff] }
  0x92   :  { %v958_v36 = vmul.f32 %v942_v26, %v926_v21  ;;  %v615_v37 = vadd.f32 %v583_v61, %v517_v27  ;;  %v274_v38 = vmul.f32 %v1829_v15, %v2484_v22  ;;  %v290_v39 = vmul.f32 %v1845_v20, %v2484_v22  ;;  %v1941_v50 = vld [vmem:[%s3812_s2 + $0x5e8] sm:$0xff]  ;;  %v1798_v8 = vld [vmem:[%s3812_s2 + $0x170] sm:$0xff] }
  0x93   :  { %v697_v42 = vadd.f32 %v665_v3, %v599_v30  ;;  %v208_v43 = vadd.f32 %v176_v32, %v110_v28  ;;  %v224_v44 = vadd.f32 %v192_v33, %v126_v31  ;;  %v372_v45 = vmul.f32 %v1861_v29, %v2486_v23  ;;  %v1957_v51 = vld [vmem:[%s3812_s2 + $0x668] sm:$0xff]  ;;  %v1814_v15 = vld [vmem:[%s3812_s2 + $0x1f0] sm:$0xff] }
  0x94   :  { %v974_v46 = vmax.f32 %v958_v36, 0.0  ;;  %v713_v52 = vadd.f32 %v681_v62, %v615_v37  ;;  %v388_v53 = vmul.f32 %v1877_v34, %v2486_v23  ;;  %v470_v56 = vmul.f32 %v1893_v35, %v2488_v24  ;;  %v1973_v57 = vld [vmem:[%s3812_s2 + $0x6e8] sm:$0xff]  ;;  %v1830_v20 = vld [vmem:[%s3812_s2 + $0x270] sm:$0xff] }
  0x95   :  { %v795_v58 = vadd.f32 %v763_v13, %v697_v42  ;;  %v306_v63 = vadd.f32 %v274_v38, %v208_v43  ;;  %v322_v59 = vadd.f32 %v290_v39, %v224_v44  ;;  %v486_v54 = vmul.f32 %v1909_v40, %v2488_v24  ;;  %v1989_v0 = vld [vmem:[%s3812_s2 + $0x768] sm:$0xff]  ;;  %v78_v13 = vld [vmem:[%s3812_s2 + $0x70] sm:$0xff] }
  0x96   :  { %v2005_v1 = vld [vmem:[%s3812_s2 + $0x7e8] sm:$0xff]  ;;  %2172 = vmatmul.mubr.msk.f32.gmra.mrb[10].mxu0 %vm981_vm0, %v974_v46  ;;  %v811_v4 = vadd.f32 %v779_v18, %v713_v52  ;;  %v568_v5 = vmul.f32 %v1925_v41, %v2490_v25  ;;  %v584_v61 = vmul.f32 %v1941_v50, %v2490_v25  ;;  %v666_v3 = vmul.f32 %v1957_v51, %v2528_v47  ;;  %v1846_v28 = vld [vmem:[%s3812_s2 + $0x2f0] sm:$0xff] }
  0x97   :  { %v2021_v60 = vld [vmem:[%s3812_s2 + $0x868] sm:$0xff]  ;;  %v893_v6 = vadd.f32 %v861_v2, %v795_v58  ;;  %v404_v7 = vadd.f32 %v372_v45, %v306_v63  ;;  %v420_v55 = vadd.f32 %v388_v53, %v322_v59  ;;  %v682_v9 = vmul.f32 %v1973_v57, %v2528_v47  ;;  %v1862_v29 = vld [vmem:[%s3812_s2 + $0x370] sm:$0xff] }
  0x98   :  { %v2037_v62 = vld [vmem:[%s3812_s2 + $0x8e8] sm:$0xff]  ;;  %v909_v16 = vadd.f32 %v877_v19, %v811_v4  ;;  %v764_v17 = vmul.f32 %v1989_v0, %v2531_v48  ;;  %v780_v18 = vmul.f32 %v2005_v1, %v2531_v48  ;;  %v862_v2 = vmul.f32 %v2021_v60, %v2534_v49  ;;  %v1878_v34 = vld [vmem:[%s3812_s2 + $0x3f0] sm:$0xff] }
  0x99   :  { %v927_v21 = vadd.f32 %v2459_v10, %v893_v6  ;;  %v502_v26 = vadd.f32 %v470_v56, %v404_v7  ;;  %v518_v27 = vadd.f32 %v486_v54, %v420_v55  ;;  %v878_v19 = vmul.f32 %v2037_v62, %v2534_v49  ;;  %v1894_v39 = vld [vmem:[%s3812_s2 + $0x470] sm:$0xff] }
  0x9a   :  { %v943_v30 = vadd.f32 %v2459_v10, %v909_v16  ;;  %v111_v31 = vmul.f32 %v2461_v11, %v78_v13  ;;  %v127_v32 = vmul.f32 %v2461_v11, %v94_v14  ;;  %v177_v33 = vmul.f32 %v1798_v8, %v2463_v12  ;;  %v1910_v40 = vld [vmem:[%s3812_s2 + $0x4f0] sm:$0xff]  ;;  %v79_v13 = vld [vmem:[%s3812_s2 + $0x78] sm:$0xff] }
  0x9b   :  { %v600_v35 = vadd.f32 %v568_v5, %v502_v26  ;;  %v616_v36 = vadd.f32 %v584_v61, %v518_v27  ;;  %v193_v37 = vmul.f32 %v1814_v15, %v2463_v12  ;;  %v275_v38 = vmul.f32 %v1830_v20, %v2484_v22  ;;  %v1926_v41 = vld [vmem:[%s3812_s2 + $0x570] sm:$0xff]  ;;  %v1799_v15 = vld [vmem:[%s3812_s2 + $0x178] sm:$0xff] }
  0x9c   :  { %v959_v42 = vmul.f32 %v943_v30, %v927_v21  ;;  %v209_v43 = vadd.f32 %v177_v33, %v111_v31  ;;  %v291_v44 = vmul.f32 %v1846_v28, %v2484_v22  ;;  %v373_v45 = vmul.f32 %v1862_v29, %v2486_v23  ;;  %v1942_v53 = vld [vmem:[%s3812_s2 + $0x5f0] sm:$0xff]  ;;  %v1815_v20 = vld [vmem:[%s3812_s2 + $0x1f8] sm:$0xff] }
  0x9d   :  { %v698_v50 = vadd.f32 %v666_v3, %v600_v35  ;;  %v714_v51 = vadd.f32 %v682_v9, %v616_v36  ;;  %v225_v46 = vadd.f32 %v193_v37, %v127_v32  ;;  %v389_v52 = vmul.f32 %v1878_v34, %v2486_v23  ;;  %v1958_v56 = vld [vmem:[%s3812_s2 + $0x670] sm:$0xff]  ;;  %v1847_v28 = vld [vmem:[%s3812_s2 + $0x2f8] sm:$0xff] }
  0x9e   :  { %v1974_v57 = vld [vmem:[%s3812_s2 + $0x6f0] sm:$0xff]  ;;  %v975_v58 = vmax.f32 %v959_v42, 0.0  ;;  %v307_v63 = vadd.f32 %v275_v38, %v209_v43  ;;  %v471_v59 = vmul.f32 %v1894_v39, %v2488_v24  ;;  %v487_v54 = vmul.f32 %v1910_v40, %v2488_v24  ;;  %v1863_v33 = vld [vmem:[%s3812_s2 + $0x378] sm:$0xff] }
  0x9f   :  { %v1990_v0 = vld [vmem:[%s3812_s2 + $0x770] sm:$0xff]  ;;  %v796_v1 = vadd.f32 %v764_v17, %v698_v50  ;;  %v812_v60 = vadd.f32 %v780_v18, %v714_v51  ;;  %v323_v4 = vadd.f32 %v291_v44, %v225_v46  ;;  %v569_v5 = vmul.f32 %v1926_v41, %v2490_v25  ;;  %v95_v18 = vld [vmem:[%s3812_s2 + $0xf8] sm:$0xff] }
  0xa0   :  { %v2006_v61 = vld [vmem:[%s3812_s2 + $0x7f0] sm:$0xff]  ;;  %2174 = vmatprep.mubr.msk.f32.mxu0 %vm981_vm0, %v975_v58  ;;  %v405_v6 = vadd.f32 %v373_v45, %v307_v63  ;;  %v585_v7 = vmul.f32 %v1942_v53, %v2490_v25  ;;  %v667_v55 = vmul.f32 %v1958_v56, %v2528_v47  ;;  %v683_v9 = vmul.f32 %v1974_v57, %v2528_v47  ;;  %v1879_v38 = vld [vmem:[%s3812_s2 + $0x3f8] sm:$0xff] }
  0xa1   :  { %v2022_v3 = vld [vmem:[%s3812_s2 + $0x870] sm:$0xff]  ;;  %v894_v14 = vadd.f32 %v862_v2, %v796_v1  ;;  %v910_v8 = vadd.f32 %v878_v19, %v812_v60  ;;  %v421_v16 = vadd.f32 %v389_v52, %v323_v4  ;;  %v765_v17 = vmul.f32 %v1990_v0, %v2531_v48  ;;  %v1831_v19 = vld [vmem:[%s3812_s2 + $0x278] sm:$0xff] }
  0xa2   :  { %v2038_v62 = vld [vmem:[%s3812_s2 + $0x8f0] sm:$0xff]  ;;  %v503_v21 = vadd.f32 %v471_v59, %v405_v6  ;;  %v781_v26 = vmul.f32 %v2006_v61, %v2531_v48  ;;  %v863_v2 = vmul.f32 %v2022_v3, %v2534_v49  ;;  %v112_v32 = vmul.f32 %v2461_v11, %v79_v13  ;;  %v1895_v39 = vld [vmem:[%s3812_s2 + $0x478] sm:$0xff] }
  0xa3   :  { %v879_v27 = vmul.f32 %v2038_v62, %v2534_v49  ;;  %v928_v29 = vadd.f32 %v2459_v10, %v894_v14  ;;  %v944_v30 = vadd.f32 %v2459_v10, %v910_v8  ;;  %v519_v31 = vadd.f32 %v487_v54, %v421_v16  ;;  %v1927_v51 = vld [vmem:[%s3812_s2 + $0x578] sm:$0xff] }
  0xa4   :  { %v601_v34 = vadd.f32 %v569_v5, %v503_v21  ;;  %v128_v35 = vmul.f32 %v2461_v11, %v95_v18  ;;  %v178_v36 = vmul.f32 %v1799_v15, %v2463_v12  ;;  %v194_v37 = vmul.f32 %v1815_v20, %v2463_v12  ;;  %v1911_v11 = vld [vmem:[%s3812_s2 + $0x4f8] sm:$0xff] }
  0xa5   :  { %v960_v40 = vmul.f32 %v944_v30, %v928_v29  ;;  %v617_v42 = vadd.f32 %v585_v7, %v519_v31  ;;  %v276_v43 = vmul.f32 %v1831_v19, %v2484_v22  ;;  %v292_v44 = vmul.f32 %v1847_v28, %v2484_v22  ;;  %v1943_v22 = vld [vmem:[%s3812_s2 + $0x5f8] sm:$0xff] }
  0xa6   :  { %v699_v45 = vadd.f32 %v667_v55, %v601_v34  ;;  %v210_v12 = vadd.f32 %v178_v36, %v112_v32  ;;  %v226_v41 = vadd.f32 %v194_v37, %v128_v35  ;;  %v374_v50 = vmul.f32 %v1863_v33, %v2486_v23  ;;  %v1959_v54 = vld [vmem:[%s3812_s2 + $0x678] sm:$0xff] }
  0xa7   :  { %v976_v46 = vmax.f32 %v960_v40, 0.0  ;;  %v715_v52 = vadd.f32 %v683_v9, %v617_v42  ;;  %v390_v53 = vmul.f32 %v1879_v38, %v2486_v23  ;;  %v472_v56 = vmul.f32 %v1895_v39, %v2488_v24  ;;  %v1975_v1 = vld [vmem:[%s3812_s2 + $0x6f8] sm:$0xff] }
  0xa8   :  { %v797_v57 = vadd.f32 %v765_v17, %v699_v45  ;;  %v308_v58 = vadd.f32 %v276_v43, %v210_v12  ;;  %v324_v63 = vadd.f32 %v292_v44, %v226_v41  ;;  %v488_v59 = vmul.f32 %v1911_v11, %v2488_v24  ;;  %v1991_v62 = vld [vmem:[%s3812_s2 + $0x778] sm:$0xff] }
  0xa9   :  { %2175 = vmatmul.mubr.msk.f32.gmra.mrb[12].mxu0 %vm981_vm0, %v976_v46  ;;  %v813_v0 = vadd.f32 %v781_v26, %v715_v52  ;;  %v570_v23 = vmul.f32 %v1927_v51, %v2490_v25  ;;  %v586_v61 = vmul.f32 %v1943_v22, %v2490_v25  ;;  %v668_v24 = vmul.f32 %v1959_v54, %v2528_v47  ;;  %v2007_v6 = vld [vmem:[%s3812_s2 + $0x7f8] sm:$0xff]  ;;  %v1177_v54 = vld [vmem:[%s3814_s4 + $0x10] sm:$0xff] }
  0xaa   :  { %v895_v60 = vadd.f32 %v863_v2, %v797_v57  ;;  %v406_v4 = vadd.f32 %v374_v50, %v308_v58  ;;  %v422_v5 = vadd.f32 %v390_v53, %v324_v63  ;;  %v684_v13 = vmul.f32 %v1975_v1, %v2528_v47  ;;  %v2023_v25 = vld [vmem:[%s3812_s2 + $0x878] sm:$0xff]  ;;  %v1180_v1 = vld [vmem:[%s3814_s4 + $0x28] sm:$0xff] }
  0xab   :  { %v911_v3 = vadd.f32 %v879_v27, %v813_v0  ;;  %v2039_v8 = vld [vmem:[%s3812_s2 + $0x8f8] sm:$0xff]  ;;  %v766_v18 = vmul.f32 %v1991_v62, %v2531_v48  ;;  %v782_v15 = vmul.f32 %v2007_v6, %v2531_v48  ;;  %v864_v47 = vmul.f32 %v2023_v25, %v2534_v49 }
  0xac   :  { %v929_v7 = vadd.f32 %v2459_v10, %v895_v60  ;;  %v504_v55 = vadd.f32 %v472_v56, %v406_v4  ;;  %v520_v9 = vadd.f32 %v488_v59, %v422_v5  ;;  %v880_v2 = vmul.f32 %v2039_v8, %v2534_v49  ;;  %v1175_v49 = vld [vmem:[%s3814_s4] sm:$0xff]  ;;  %v1176_v59 = vld [vmem:[%s3814_s4 + $0x8] sm:$0xff]  ;;  %v1178_v0 = vld [vmem:[%s3814_s4 + $0x18] sm:$0xff] }
  0xad   :  { %v945_v14 = vadd.f32 %v2459_v10, %v911_v3  ;;  %2212 = vmatprep.mubr.f32.mxu1 %v1175_v49  ;;  %v1181_v60 = vld [vmem:[%s3814_s4 + $0x30] sm:$0xff]  ;;  %v1182_v4 = vld [vmem:[%s3814_s4 + $0x38] sm:$0xff]  ;;  %v2056_v5 = vld [vmem:[%s3815_s5] ss:$0 sm:$0xff] }
  0xae   :  { %v602_v16 = vadd.f32 %v570_v23, %v504_v55  ;;  %v618_v17 = vadd.f32 %v586_v61, %v520_v9  ;;  %v1179_v23 = vld [vmem:[%s3814_s4 + $0x20] sm:$0xff] }
  0xaf   :  { %v961_v20 = vmul.f32 %v945_v14, %v929_v7 }
  0xb0   :  { %v700_v21 = vadd.f32 %v668_v24, %v602_v16  ;;  %v716_v26 = vadd.f32 %v684_v13, %v618_v17 }
  0xb1   :  { %v977_v27 = vmax.f32 %v961_v20, 0.0 }
  0xb2   :  { %v798_v19 = vadd.f32 %v766_v18, %v700_v21  ;;  %v814_v28 = vadd.f32 %v782_v15, %v716_v26 }
  0xb3   :  { %2177 = vmatprep.mubr.msk.f32.mxu0 %vm981_vm0, %v977_v27 }
  0xb4   :  { %v896_v29 = vadd.f32 %v864_v47, %v798_v19  ;;  %v912_v30 = vadd.f32 %v880_v2, %v814_v28 }
  0xb6   :  { %v930_v31 = vadd.f32 %v2459_v10, %v896_v29  ;;  %v946_v32 = vadd.f32 %v2459_v10, %v912_v30  ;;  %v1303_v10 = vld [vmem:[%s3816_s6] sm:$0xff] }
  0xb7   :  { %2224 = vmatprep.subr.mxu0 %v1303_v10  ;;  %v1434_v29 = vld [vmem:[%s3817_s7] sm:$0xff] }
  0xb8   :  { %v962_v33 = vmul.f32 %v946_v32, %v930_v31  ;;  %2225 = vmatpush3.msra.mxu0 %v1303_v10  ;;  %v1435_v10 = vld [vmem:[%s3817_s7 + $0x8] sm:$0xff] }
  0xba   :  { %v978_v48 = vmax.f32 %v962_v33, 0.0 }
  0xbc   :  { %2178 = vmatmul.mubr.msk.f32.gmra.mrb[14].mxu0 %vm981_vm0, %v978_v48 }
 0x10b   :  { %v2158_v34 = vpop.f32.mrb[0].mxu0 }
 0x10c   :  { %v1096_v35 = vpop.f32.mrb[1].mxu0 }
 0x10d   :  { %v2275_v36 = vpack.c.bf16 %v2158_v34, %v1096_v35 }
 0x10f   :  { %2276 = vmatprep.subr.bf16.mxu1 %v2275_v36 }
 0x110   :  { %2278 = vmatpush3.bf16.msra.mxu1 %v2275_v36 }
 0x11e   :  { %v2161_v37 = vpop.f32.mrb[2].mxu0 }
 0x11f   :  { %v1106_v38 = vpop.f32.mrb[3].mxu0 }
 0x120   :  { %v2279_v39 = vpack.c.bf16 %v2161_v37, %v1106_v38 }
 0x122   :  { %2280 = vmatprep.subr.bf16.mxu1 %v2279_v39 }
 0x123   :  { %2282 = vmatpush3.bf16.msra.mxu1 %v2279_v39 }
 0x130   :  { %v2164_v40 = vpop.f32.mrb[4].mxu0 }
 0x131   :  { %v1116_v42 = vpop.f32.mrb[5].mxu0 }
 0x132   :  { %v2283_v43 = vpack.c.bf16 %v2164_v40, %v1116_v42  ;;  %v1436_v40 = vld [vmem:[%s3817_s7 + $0x10] sm:$0xff]  ;;  %v1437_v42 = vld [vmem:[%s3817_s7 + $0x18] sm:$0xff] }
 0x134   :  { %2284 = vmatprep.subr.bf16.mxu1 %v2283_v43 }
 0x135   :  { %2286 = vmatpush3.bf16.msra.mxu1 %v2283_v43  ;;  %v2065_v43 = vld [vmem:[%s3818_s8] ss:$0 sm:$0xff] }
 0x143   :  { %v2167_v44 = vpop.f32.mrb[6].mxu0 }
 0x144   :  { %v1126_v11 = vpop.f32.mrb[7].mxu0 }
 0x145   :  { %v2287_v45 = vpack.c.bf16 %v2167_v44, %v1126_v11 }
 0x147   :  { %2288 = vmatprep.subr.bf16.mxu1 %v2287_v45 }
 0x148   :  { %2290 = vmatpush3.bf16.msra.mxu1 %v2287_v45 }
 0x156   :  { %v2170_v12 = vpop.f32.mrb[8].mxu0 }
 0x157   :  { %v1136_v41 = vpop.f32.mrb[9].mxu0 }
 0x158   :  { %v2291_v50 = vpack.c.bf16 %v2170_v12, %v1136_v41  ;;  %v2071_v41 = vld [vmem:[%s3819_s9 + $0x28] sm:$0xff] }
 0x15a   :  { %2292 = vmatprep.subr.bf16.mxu1 %v2291_v50 }
 0x15b   :  { %2294 = vmatpush3.bf16.msra.mxu1 %v2291_v50  ;;  %v1550_v50 = vld [vmem:[%s3819_s9 + $0x8] sm:$0xff] }
 0x169   :  { %v2173_v51 = vpop.f32.mrb[10].mxu0 }
 0x16a   :  { %v1146_v46 = vpop.f32.mrb[11].mxu0 }
 0x16b   :  { %v2295_v52 = vpack.c.bf16 %v2173_v51, %v1146_v46 }
 0x16d   :  { %2296 = vmatprep.subr.bf16.mxu1 %v2295_v52 }
 0x16e   :  { %2298 = vmatpush3.bf16.msra.mxu1 %v2295_v52  ;;  %v2075_v52 = vld [vmem:[%s3819_s9 + $0x48] sm:$0xff] }
 0x17c   :  { %v2176_v53 = vpop.f32.mrb[12].mxu0 }
 0x17d   :  { %v1156_v56 = vpop.f32.mrb[13].mxu0 }
 0x17e   :  { %v2299_v22 = vpack.c.bf16 %v2176_v53, %v1156_v56  ;;  %v1549_v53 = vld [vmem:[%s3819_s9] sm:$0xff] }
 0x180   :  { %2300 = vmatprep.subr.bf16.mxu1 %v2299_v22 }
 0x181   :  { %2302 = vmatpush3.bf16.msra.mxu1 %v2299_v22 }
 0x18f   :  { %v2179_v57 = vpop.f32.mrb[14].mxu0 }
 0x190   :  { %v1166_v58 = vpop.f32.mrb[15].mxu0 }
 0x191   :  { %v2303_v63 = vpack.c.bf16 %v2179_v57, %v1166_v58 }
 0x193   :  { %2304 = vmatprep.subr.bf16.mxu1 %v2303_v63 }
 0x194   :  { %2306 = vmatpush3.bf16.msra.mxu1 %v2303_v63 }
 0x197   :  { %2213 = vmatmul.mubr.f32.vlgmr.msra.gmra.mrb[0].mxu1 %v1176_v59 }
 0x198   :  { %2215 = vmatprep.mubr.f32.mxu1 %v1177_v54 }
 0x19b   :  { %2216 = vmatmul.mubr.f32.gmra.mrb[2].mxu1 %v1178_v0 }
 0x19c   :  { %2218 = vmatprep.mubr.f32.mxu1 %v1179_v23  ;;  %v2079_v23 = vld [vmem:[%s3819_s9 + $0x68] sm:$0xff] }
 0x19f   :  { %2219 = vmatmul.mubr.f32.gmra.mrb[4].mxu1 %v1180_v1  ;;  %v2074_v1 = vld [vmem:[%s3819_s9 + $0x40] sm:$0xff] }
 0x1a0   :  { %2221 = vmatprep.mubr.f32.mxu1 %v1181_v60 }
 0x1a3   :  { %2222 = vmatmul.mubr.f32.gmra.mrb[6].mxu1 %v1182_v4 }
 0x1a4   :  { %2254 = vmatprep.mubr.msk.f32.mxu1 %vm1445_vm2, %v1434_v29  ;;  %v2076_v29 = vld [vmem:[%s3819_s9 + $0x50] sm:$0xff] }
 0x26a   :  { %v2214_v61 = vpop.f32.mrb[0].mxu1 }
 0x26b   :  { %v1262_v3 = vadd.f32 %v2214_v61, %v2056_v5  ;;  %v1256_v24 = vpop.f32.mrb[1].mxu1 }
 0x26c   :  { %v1257_v62 = vadd.f32 %v2056_v5, %v1256_v24 }
 0x26d   :  { %v1296_v55 = vmax.f32 %v1262_v3, 0.0 }
 0x26e   :  { %v1295_v6 = vmax.f32 %v1257_v62, 0.0  ;;  %v2217_v7 = vpop.f32.mrb[2].mxu1  ;;  %v2070_v62 = vld [vmem:[%s3819_s9 + $0x20] sm:$0xff] }
 0x26f   :  { %v1272_v9 = vadd.f32 %v2217_v7, %v2056_v5  ;;  %v1266_v13 = vpop.f32.mrb[3].mxu1 }
 0x270   :  { %v1267_v14 = vadd.f32 %v2056_v5, %v1266_v13  ;;  %2226 = vmatprep.mubr.msk.f32.mxu0 %vm1304_vm1, %v1295_v6  ;;  %v2078_v6 = vld [vmem:[%s3819_s9 + $0x60] sm:$0xff]  ;;  %v1551_v13 = vld [vmem:[%s3819_s9 + $0x10] sm:$0xff] }
 0x271   :  { %2227 = vmatmul.mubr.msk.f32.vlgmr.msra.gmra.mrb[16].mxu0 %vm1304_vm1, %v1296_v55  ;;  %v1298_v16 = vmax.f32 %v1272_v9, 0.0  ;;  %v1552_v9 = vld [vmem:[%s3819_s9 + $0x18] sm:$0xff] }
 0x272   :  { %v1297_v25 = vmax.f32 %v1267_v14, 0.0  ;;  %v2220_v8 = vpop.f32.mrb[4].mxu1 }
 0x273   :  { %v1282_v17 = vadd.f32 %v2220_v8, %v2056_v5  ;;  %v1276_v18 = vpop.f32.mrb[5].mxu1 }
 0x274   :  { %v1277_v15 = vadd.f32 %v2056_v5, %v1276_v18  ;;  %2229 = vmatprep.mubr.msk.f32.mxu0 %vm1304_vm1, %v1297_v25 }
 0x275   :  { %2230 = vmatmul.mubr.msk.f32.gmra.mrb[18].mxu0 %vm1304_vm1, %v1298_v16  ;;  %v1300_v26 = vmax.f32 %v1282_v17, 0.0 }
 0x276   :  { %v1299_v20 = vmax.f32 %v1277_v15, 0.0  ;;  %v2223_v21 = vpop.f32.mrb[6].mxu1 }
 0x277   :  { %v1292_v47 = vadd.f32 %v2223_v21, %v2056_v5  ;;  %v1286_v2 = vpop.f32.mrb[7].mxu1  ;;  %v2073_v21 = vld [vmem:[%s3819_s9 + $0x38] sm:$0xff] }
 0x278   :  { %v1287_v27 = vadd.f32 %v2056_v5, %v1286_v2  ;;  %2232 = vmatprep.mubr.msk.f32.mxu0 %vm1304_vm1, %v1299_v20 }
 0x279   :  { %2233 = vmatmul.mubr.msk.f32.gmra.mrb[20].mxu0 %vm1304_vm1, %v1300_v26  ;;  %v1302_v28 = vmax.f32 %v1292_v47, 0.0  ;;  %v2072_v26 = vld [vmem:[%s3819_s9 + $0x30] sm:$0xff] }
 0x27a   :  { %v1301_v19 = vmax.f32 %v1287_v27, 0.0 }
 0x27c   :  { %2235 = vmatprep.mubr.msk.f32.mxu0 %vm1304_vm1, %v1301_v19 }
 0x27d   :  { %2236 = vmatmul.mubr.msk.f32.gmra.mrb[22].mxu0 %vm1304_vm1, %v1302_v28  ;;  %v2077_v28 = vld [vmem:[%s3819_s9 + $0x58] sm:$0xff] }
 0x344   :  { %v2228_v30 = vpop.f32.mrb[16].mxu0 }
 0x345   :  { %v1395_v31 = vpop.f32.mrb[17].mxu0 }
 0x346   :  { %v2307_v32 = vpack.c.bf16 %v2228_v30, %v1395_v31 }
 0x348   :  { %v2231_v33 = vpop.f32.mrb[18].mxu0  ;;  %2308 = vmatprep.subr.bf16.mxu1 %v2307_v32 }
 0x349   :  { %v1405_v48 = vpop.f32.mrb[19].mxu0  ;;  %2310 = vmatpush3.bf16.msra.mxu1 %v2307_v32 }
 0x34a   :  { %v2311_v34 = vpack.c.bf16 %v2231_v33, %v1405_v48  ;;  %v2081_v48 = vld [vmem:[%s3819_s9 + $0x78] sm:$0xff] }
 0x34c   :  { %v2234_v35 = vpop.f32.mrb[20].mxu0  ;;  %2312 = vmatprep.subr.bf16.mxu1 %v2311_v34 }
 0x34d   :  { %v1415_v36 = vpop.f32.mrb[21].mxu0  ;;  %2314 = vmatpush3.bf16.msra.mxu1 %v2311_v34  ;;  %v2080_v34 = vld [vmem:[%s3819_s9 + $0x70] sm:$0xff] }
 0x34e   :  { %v2315_v49 = vpack.c.bf16 %v2234_v35, %v1415_v36 }
 0x350   :  { %v2237_v37 = vpop.f32.mrb[22].mxu0  ;;  %2316 = vmatprep.subr.bf16.mxu1 %v2315_v49 }
 0x351   :  { %v1425_v38 = vpop.f32.mrb[23].mxu0  ;;  %2318 = vmatpush3.bf16.msra.mxu1 %v2315_v49 }
 0x352   :  { %v2319_v39 = vpack.c.bf16 %v2237_v37, %v1425_v38 }
 0x354   :  { %2320 = vmatprep.subr.bf16.mxu1 %v2319_v39 }
 0x355   :  { %2322 = vmatpush3.bf16.msra.mxu1 %v2319_v39 }
 0x358   :  { %2255 = vmatmul.mubr.msk.f32.vlgmr.msra.gmra.mrb[8].mxu1 %vm1445_vm2, %v1435_v10  ;;  %v2352_v10 = vmov 0.0|0.0  }
 0x359   :  { %2257 = vmatprep.mubr.msk.f32.mxu1 %vm1445_vm2, %v1436_v40  ;;  %2323 = vmatprep.subr.bf16.mxu0 %v2352_v10  ;;  %v2354_v40 = vmov 0.0  }
 0x35a   :  { %2268 = vmatprep.mubr.msk.f32.mxu0 %vm2353_vm4, %v2354_v40 }
 0x35c   :  { %2258 = vmatmul.mubr.msk.f32.gmra.mrb[10].mxu1 %vm1445_vm2, %v1437_v42  ;;  %v1547_v42 = vlaneseq }
 0x42b   :  { %v2256_v44 = vpop.f32.mrb[8].mxu1 }
 0x42c   :  { %v1530_v11 = vadd.f32 %v2256_v44, %v2065_v43  ;;  %v1524_v45 = vpop.f32.mrb[9].mxu1 }
 0x42d   :  { %v1525_v12 = vadd.f32 %v2065_v43, %v1524_v45 }
 0x42e   :  { %v1544_v51 = vmax.f32 %v1530_v11, 0.0  ;;  %v1548_v11 = vand.u32 127, %v1547_v42 }
 0x42f   :  { %v1543_v46 = vmax.f32 %v1525_v12, 0.0  ;;  %v2259_v56 = vpop.f32.mrb[10].mxu1 }
 0x430   :  { %v1587_v22 = vmul.f32 %v2071_v41, %v1544_v51  ;;  %v1554_v57 = vmul.f32 %v1550_v50, %v1544_v51  ;;  %v1534_v58 = vpop.f32.mrb[11].mxu1  ;;  %v1619_v54 = vmul.f32 %v2075_v52, %v1544_v51  ;;  %v1540_v60 = vadd.f32 %v2259_v56, %v2065_v43 }
 0x431   :  { %v1553_v0 = vmul.f32 %v1549_v53, %v1543_v46  ;;  %v1535_v4 = vadd.f32 %v2065_v43, %v1534_v58  ;;  %v1651_v3 = vmul.f32 %v2079_v23, %v1544_v51  ;;  %v1618_v24 = vmul.f32 %v2074_v1, %v1543_v46 }
 0x432   :  { %v1593_v63 = vsel %vm1557_vm3, %v1587_v22, 0.0  ;;  %v1561_v59 = vsel %vm1557_vm3, %v1554_v57, 0.0  ;;  %v1625_v5 = vsel %vm1557_vm3, %v1619_v54, 0.0  ;;  %v1546_v7 = vmax.f32 %v1540_v60, 0.0 }
 0x433   :  { %1594 = vadd.xlane.f32.xlu1 %v1593_v63  ;;  %1562 = vadd.xlane.f32.xlu0 %v1561_v59  ;;  %v1558_v61 = vsel %vm1557_vm3, %v1553_v0, 0.0  ;;  %v1545_v55 = vmax.f32 %v1535_v4, 0.0  ;;  %v1657_v14 = vsel %vm1557_vm3, %v1651_v3, 0.0  ;;  %v1622_v25 = vsel %vm1557_vm3, %v1618_v24, 0.0 }
 0x434   :  { %v1586_v8 = vmul.f32 %v2070_v62, %v1543_v46  ;;  %v1650_v16 = vmul.f32 %v2078_v6, %v1543_v46  ;;  %v1556_v17 = vmul.f32 %v1552_v9, %v1546_v7  ;;  %v1589_v27 = vmul.f32 %v2073_v21, %v1546_v7 }
 0x435   :  { %v1555_v18 = vmul.f32 %v1551_v13, %v1545_v55  ;;  %v1588_v19 = vmul.f32 %v2072_v26, %v1545_v55  ;;  %v1621_v32 = vmul.f32 %v2077_v28, %v1546_v7  ;;  %v1620_v33 = vmul.f32 %v2076_v29, %v1545_v55  ;;  %v1677_v28 = vld [vmem:[%s3820_s10] sm:$0xff] }
 0x436   :  { %v1590_v15 = vsel %vm1557_vm3, %v1586_v8, 0.0  ;;  %v1654_v20 = vsel %vm1557_vm3, %v1650_v16, 0.0  ;;  %v1567_v47 = vsel %vm1557_vm3, %v1556_v17, 0.0  ;;  %v1599_v30 = vsel %vm1557_vm3, %v1589_v27, 0.0  ;;  %v2082_v29 = vld [vmem:[%s3821_s11] ss:$0 sm:$0xff] }
 0x437   :  { %1626 = vadd.xlane.f32.xlu1 %v1625_v5  ;;  %1559 = vadd.xlane.f32.xlu0 %v1558_v61  ;;  %v1564_v2 = vsel %vm1557_vm3, %v1555_v18, 0.0  ;;  %v1596_v31 = vsel %vm1557_vm3, %v1588_v19, 0.0  ;;  %v1631_v35 = vsel %vm1557_vm3, %v1621_v32, 0.0  ;;  %v1628_v36 = vsel %vm1557_vm3, %v1620_v33, 0.0 }
 0x438   :  { %v1653_v49 = vmul.f32 %v2081_v48, %v1546_v7  ;;  %v1652_v37 = vmul.f32 %v2080_v34, %v1545_v55  ;;  %vm1602_vm5 = vcmp.eq.s32.totalorder %v1548_v11, 1  ;;  %vm1570_vm6 = vcmp.eq.s32.totalorder %v1548_v11, 0 }
 0x439   :  { %vm1634_vm7 = vcmp.eq.s32.totalorder %v1548_v11, 2  ;;  %vm1666_vm8 = vcmp.eq.s32.totalorder %v1548_v11, 3 }
 0x43a   :  { %v1663_v38 = vsel %vm1557_vm3, %v1653_v49, 0.0  ;;  %v1660_v39 = vsel %vm1557_vm3, %v1652_v37, 0.0 }
 0x43b   :  { %1658 = vadd.xlane.f32.xlu1 %v1657_v14  ;;  %1623 = vadd.xlane.f32.xlu0 %v1622_v25 }
 0x43f   :  { %1591 = vadd.xlane.f32.xlu1 %v1590_v15  ;;  %1655 = vadd.xlane.f32.xlu0 %v1654_v20 }
 0x443   :  { %1568 = vadd.xlane.f32.xlu1 %v1567_v47  ;;  %1565 = vadd.xlane.f32.xlu0 %v1564_v2 }
 0x447   :  { %1600 = vadd.xlane.f32.xlu1 %v1599_v30  ;;  %1597 = vadd.xlane.f32.xlu0 %v1596_v31 }
 0x44b   :  { %1632 = vadd.xlane.f32.xlu1 %v1631_v35  ;;  %1629 = vadd.xlane.f32.xlu0 %v1628_v36 }
 0x44f   :  { %1664 = vadd.xlane.f32.xlu1 %v1663_v38  ;;  %1661 = vadd.xlane.f32.xlu0 %v1660_v39 }
 0x4c0   :  { %v1595_v43 = vpop.xlane.xlu1 %1594  ;;  %v1563_v44 = vpop.xlane.xlu0 %1562 }
 0x4c1   :  { %v1606_v51 = vsel %vm1602_vm5, %v1595_v43, 0.0  ;;  %v1574_v46 = vsel %vm1570_vm6, %v1563_v44, 0.0 }
 0x4c2   :  { %v1610_v58 = vadd.f32 %v1606_v51, %v1574_v46 }
 0x4c4   :  { %v1627_v45 = vpop.xlane.xlu1 %1626  ;;  %v1560_v12 = vpop.xlane.xlu0 %1559 }
 0x4c5   :  { %v1638_v56 = vsel %vm1634_vm7, %v1627_v45, 0.0  ;;  %v1573_v22 = vsel %vm1570_vm6, %v1560_v12, 0.0 }
 0x4c6   :  { %v1642_v0 = vadd.f32 %v1638_v56, %v1610_v58 }
 0x4c8   :  { %v1659_v41 = vpop.xlane.xlu1 %1658  ;;  %v1624_v50 = vpop.xlane.xlu0 %1623 }
 0x4c9   :  { %v1670_v59 = vsel %vm1666_vm8, %v1659_v41, 0.0  ;;  %v1637_v54 = vsel %vm1634_vm7, %v1624_v50, 0.0 }
 0x4ca   :  { %v1674_v5 = vadd.f32 %v1670_v59, %v1642_v0 }
 0x4cc   :  { %v1592_v52 = vpop.xlane.xlu1 %1591  ;;  %v1656_v53 = vpop.xlane.xlu0 %1655 }
 0x4cd   :  { %v1605_v57 = vsel %vm1602_vm5, %v1592_v52, 0.0  ;;  %v1669_v4 = vsel %vm1666_vm8, %v1656_v53, 0.0 }
 0x4ce   :  { %v1609_v63 = vadd.f32 %v1605_v57, %v1573_v22 }
 0x4d0   :  { %v1641_v23 = vadd.f32 %v1637_v54, %v1609_v63  ;;  %v1569_v1 = vpop.xlane.xlu1 %1568  ;;  %v1566_v60 = vpop.xlane.xlu0 %1565 }
 0x4d1   :  { %v1576_v13 = vsel %vm1570_vm6, %v1569_v1, 0.0  ;;  %v1575_v14 = vsel %vm1570_vm6, %v1566_v60, 0.0 }
 0x4d2   :  { %v1673_v61 = vadd.f32 %v1669_v4, %v1641_v23 }
 0x4d4   :  { %v2324_v3 = vpack.c.bf16 %v1674_v5, %v1673_v61  ;;  %v1601_v24 = vpop.xlane.xlu1 %1600  ;;  %v1598_v62 = vpop.xlane.xlu0 %1597 }
 0x4d5   :  { %v1608_v6 = vsel %vm1602_vm5, %v1601_v24, 0.0  ;;  %v1607_v7 = vsel %vm1602_vm5, %v1598_v62, 0.0 }
 0x4d6   :  { %2325 = vmatpush3.bf16.msra.mxu0 %v2324_v3  ;;  %v1612_v16 = vadd.f32 %v1608_v6, %v1576_v13  ;;  %v1611_v17 = vadd.f32 %v1607_v7, %v1575_v14 }
 0x4d7   :  { %2326 = vmatprep.subr.bf16.mxu0 %v2352_v10 }
 0x4d8   :  { %v1633_v55 = vpop.xlane.xlu1 %1632  ;;  %v1630_v9 = vpop.xlane.xlu0 %1629 }
 0x4d9   :  { %v1640_v25 = vsel %vm1634_vm7, %v1633_v55, 0.0  ;;  %v1639_v8 = vsel %vm1634_vm7, %v1630_v9, 0.0 }
 0x4da   :  { %v1644_v18 = vadd.f32 %v1640_v25, %v1612_v16  ;;  %v1643_v15 = vadd.f32 %v1639_v8, %v1611_v17 }
 0x4dc   :  { %v1665_v20 = vpop.xlane.xlu1 %1664  ;;  %v1662_v21 = vpop.xlane.xlu0 %1661 }
 0x4dd   :  { %v1672_v26 = vsel %vm1666_vm8, %v1665_v20, 0.0  ;;  %v1671_v47 = vsel %vm1666_vm8, %v1662_v21, 0.0 }
 0x4de   :  { %v1676_v2 = vadd.f32 %v1672_v26, %v1644_v18  ;;  %v1675_v27 = vadd.f32 %v1671_v47, %v1643_v15 }
 0x4e0   :  { %v2327_v19 = vpack.c.bf16 %v1676_v2, %v1675_v27 }
 0x4e2   :  { %2328 = vmatpush3.bf16.msra.mxu0 %v2327_v19 }
 0x4e5   :  { %2269 = vmatmul.mubr.msk.f32.vlgmr.msra.gmra.mrb[24].mxu0 %vm1685_vm9, %v1677_v28 }
 0x5b8   :  { %v1755_v30 = vpop.f32.mrb[24].mxu0 }
 0x5b9   :  { %v1756_v31 = vadd.f32 %v2082_v29, %v1755_v30  ;;  %v2270_v32 = vpop.f32.mrb[25].mxu0 }
 0x5bb   :  { %v1759_v33 = vsel %vm1557_vm3, %v1756_v31, -inf }
 0x5bc   :  { %1760 = vmax.xlane.f32.xlu0 %v1759_v33 }
 0x649   :  { %v1761_v48 = vpop.xlane.xlu0 %1760 }
 0x64a   :  { %v1762_v34 = vsub.f32 %v1756_v31, %v1761_v48 }
 0x64c   :  { %v1763_v35 = vmul.f32 1.442695, %v1762_v34 }
 0x64e   :  { %2333 = vpow2.f32 %v1763_v35 }
 0x658   :  { %v2334_v36 = vpop.eup %2333 }
 0x659   :  { %v1765_v49 = vsel %vm1557_vm3, %v2334_v36, 0.0 }
 0x65a   :  { %1766 = vadd.xlane.f32.xlu1 %v1765_v49 }
 0x6e7   :  { %v1767_v37 = vpop.xlane.xlu1 %1766 }
 0x6e8   :  { %2335 = vrcp.f32 %v1767_v37 }
 0x6f2   :  { %v2336_v38 = vpop.eup %2335 }
 0x6f3   :  { %v1769_v39 = vmul.f32 %v2336_v38, %v2334_v36 }
 0x6f5   :  { %1770 = vst.msk [vmem:[%s3824_s23] sm:$0xff] %vm1557_vm3, %v1769_v39 }
 0x6f6   :  { %1775 = vsyncpa [#allocation4], 1 }

</bundles_post_ra>
